<compile_context>
chip_gen: v7x
topology: tpu7x:2x2x1
jax: 0.10.0
libtpu: 0.0.40
codegen_flags: <defaults>
</compile_context>

<pallas_src>
import jax
import jax.numpy as jnp
from jax import lax
from jax.experimental import pallas as pl
from jax.experimental.pallas import tpu as pltpu


def downsample_kernel(x_ref, w_ref, b_ref, out_ref):
    """x_ref: (Bt, 4, Hp, Wp, C) bf16 phase tensors of the padded input.
       w_ref: (9*C, C) bf16 fused 3x3 weight.  b_ref: (1, C) fp32 bias.
       out_ref: (Bt, Ho, Wo, C) fp32."""
    bt, ho, wo, c = out_ref.shape

    x = x_ref[...]                                   # (Bt, 4, Hp, Wp, C) bf16

    # Extract the 9 taps of the 3x3 stride-2 window.  Because the wrapper
    # pre-split the padded input into (row-parity, col-parity) phases, every
    # tap is a *contiguous* static slice (no strided access in the kernel).
    taps = []
    for kh in range(3):
        ph, r0 = kh % 2, kh // 2
        for kw in range(3):
            pw, c0 = kw % 2, kw // 2
            tap = x[:, ph * 2 + pw, r0:r0 + ho, c0:c0 + wo, :]   # (Bt,Ho,Wo,C)
            taps.append(tap)

    # One wide patch matrix -> single fused MXU matmul (bf16 in, fp32 acc).
    patch = jnp.concatenate(taps, axis=-1)           # (Bt, Ho, Wo, 9C) bf16
    patch = patch.reshape(bt * ho * wo, 9 * c)       # (M, 9C)
    acc = jnp.dot(patch, w_ref[...],
                  preferred_element_type=jnp.float32)            # (M, C) fp32
    out = acc + b_ref[...]                                       # fp32 bias add

    out_ref[...] = out.reshape(bt, ho, wo, c).astype(out_ref.dtype)


def _vmem_limit_bytes(bt, hp, wp, ho, wo, c):
    xb = bt * 4 * hp * wp * c * 2          # bf16 input block
    wb = 9 * c * c * 2                      # bf16 fused weight
    bb = c * 4                              # fp32 bias
    ob = bt * ho * wo * c * 4               # fp32 output block
    tmp = bt * ho * wo * (9 * c * 2 + c * 4)  # patch + accumulator temporaries
    need = 2 * (xb + ob) + 2 * (wb + bb) + tmp   # double-buffered pipeline
    return int(min(max(4 * need, 4 << 20), 48 << 20))


def downsample_pallas(x_nchw, weight, bias, *, batch_tile=None):
    """weight: (C, C, 3, 3) PyTorch OIHW layout, bias: (C,). Returns NCHW fp32."""
    B, C, H, W = x_nchw.shape
    assert weight.shape == (C, C, 3, 3)
    Ho = (H - 1) // 2 + 1
    Wo = (W - 1) // 2 + 1
    Hp, Wp = Ho + 1, Wo + 1

    Bt = batch_tile if batch_tile is not None else (2 if B % 2 == 0 else 1)
    assert B % Bt == 0

    # ---- layout plumbing (XLA): NCHW -> NHWC, zero-pad, phase split, bf16 ----
    x = jnp.transpose(x_nchw, (0, 2, 3, 1)).astype(jnp.bfloat16)
    x_pad = jnp.pad(x, ((0, 0), (1, 1), (1, 1), (0, 0)))
    phases = []
    for ph in (0, 1):
        for pw in (0, 1):
            p = x_pad[:, ph::2, pw::2, :]
            p = jnp.pad(p, ((0, 0),
                            (0, Hp - p.shape[1]),
                            (0, Wp - p.shape[2]),
                            (0, 0)))
            phases.append(p)
    x_ph = jnp.stack(phases, axis=1)                 # (B, 4, Hp, Wp, C) bf16

    # (Cout, Cin, 3, 3) -> (3, 3, Cin, Cout) -> (9*Cin, Cout); row (kh*3+kw)*C+ci
    w_cat = jnp.transpose(weight, (2, 3, 1, 0)).reshape(9 * C, C).astype(jnp.bfloat16)
    b_row = bias.reshape(1, C).astype(jnp.float32)

    out = pl.pallas_call(
        downsample_kernel,
        out_shape=jax.ShapeDtypeStruct((B, Ho, Wo, C), jnp.float32),
        grid_spec=pltpu.PrefetchScalarGridSpec(
            num_scalar_prefetch=0,
            grid=(B // Bt,),
            in_specs=[
                pl.BlockSpec((Bt, 4, Hp, Wp, C), lambda i: (i, 0, 0, 0, 0)),
                pl.BlockSpec((9 * C, C), lambda i: (0, 0)),
                pl.BlockSpec((1, C), lambda i: (0, 0)),
            ],
            out_specs=pl.BlockSpec((Bt, Ho, Wo, C), lambda i: (i, 0, 0, 0)),
        ),
        compiler_params=pltpu.CompilerParams(
            dimension_semantics=("parallel",),
            vmem_limit_bytes=_vmem_limit_bytes(Bt, Hp, Wp, Ho, Wo, C)),
    )(x_ph, w_cat, b_row)

    return jnp.transpose(out, (0, 3, 1, 2))          # back to NCHW


def downsample_reference(x, weight, bias, *, bf16_operands=False):
    """Pure-JAX reference matching the PyTorch forward (conv 3x3, stride 2, pad 1)."""
    if bf16_operands:
        lhs, rhs = x.astype(jnp.bfloat16), weight.astype(jnp.bfloat16)
    else:
        lhs, rhs = x, weight
    y = lax.conv_general_dilated(
        lhs, rhs, window_strides=(2, 2), padding=((1, 1), (1, 1)),
        dimension_numbers=("NCHW", "OIHW", "NCHW"),
        preferred_element_type=jnp.float32)
    return y + bias[None, :, None, None]


if __name__ == "__main__":
    # Small but TPU-friendly shapes: C multiple of 128 keeps every store lane-dense.
    B, C, H, W = 4, 128, 16, 16

    key = jax.random.PRNGKey(0)
    kx, kw, kb = jax.random.split(key, 3)
    x = jax.random.normal(kx, (B, C, H, W), jnp.float32)

    # Xavier-uniform weight (as in DownSample.initialize); bias is zero in the
    # module init but made nonzero here to exercise the bias-add path.
    fan = 9 * C
    bound = (6.0 / (fan + fan)) ** 0.5
    weight = jax.random.uniform(kw, (C, C, 3, 3), jnp.float32, -bound, bound)
    bias = 0.1 * jax.random.normal(kb, (C,), jnp.float32)

    out = jax.block_until_ready(downsample_pallas(x, weight, bias))
    assert out.shape == (B, C, H // 2, W // 2)

    # Tight check vs a reference using the same bf16 operands / fp32 accumulation.
    ref_bf16 = downsample_reference(x, weight, bias, bf16_operands=True)
    err_b = float(jnp.max(jnp.abs(out - ref_bf16)))
    assert err_b < 5e-3, f"bf16-operand reference mismatch: {err_b}"

    # Sanity check vs the exact fp32 conv (tolerance accounts for bf16 operands).
    ref_f32 = downsample_reference(x, weight, bias, bf16_operands=False)
    err_f = float(jnp.max(jnp.abs(out - ref_f32)))
    assert err_f < 3e-2, f"fp32 reference mismatch: {err_f}"

    print("KERNEL_OK")
</pallas_src>

<mosaic_0001>
module attributes {stable_mosaic.version = 11 : i64} {
  func.func @downsample_kernel(%arg0: i32, %arg1: memref<2x4x9x9x128xbf16, #tpu.memory_space<vmem>>, %arg2: memref<1152x128xbf16, #tpu.memory_space<vmem>>, %arg3: memref<1x128xf32, #tpu.memory_space<vmem>>, %arg4: memref<2x8x8x128xf32, #tpu.memory_space<vmem>>) attributes {dimension_semantics = [#tpu.dimension_semantics<parallel>], iteration_bounds = array<i64: 2>, scalar_prefetch = 0 : i64, scratch_operands = 0 : i64, tpu.core_type = #tpu.core_type<tc>, window_params = [{transform_indices = @transform_0, window_bounds = array<i64: 2, 4, 9, 9, 128>}, {pipeline_mode = #tpu.pipeline_mode<synchronous>, transform_indices = @transform_1, window_bounds = array<i64: 1152, 128>}, {pipeline_mode = #tpu.pipeline_mode<synchronous>, transform_indices = @transform_2, window_bounds = array<i64: 1, 128>}, {transform_indices = @transform_3, window_bounds = array<i64: 2, 8, 8, 128>}]} {
    %c0 = arith.constant 0 : index
    %c0_0 = arith.constant 0 : index
    %c0_1 = arith.constant 0 : index
    %c0_2 = arith.constant 0 : index
    %c0_3 = arith.constant 0 : index
    %0 = vector.load %arg1[%c0, %c0_0, %c0_1, %c0_2, %c0_3] : memref<2x4x9x9x128xbf16, #tpu.memory_space<vmem>>, vector<2x4x9x9x128xbf16>
    %1 = vector.extract_strided_slice %0 {offsets = [0, 0, 0, 0, 0], sizes = [2, 1, 8, 8, 128], strides = [1, 1, 1, 1, 1]} : vector<2x4x9x9x128xbf16> to vector<2x1x8x8x128xbf16>
    %2 = vector.shape_cast %1 : vector<2x1x8x8x128xbf16> to vector<2x8x8x128xbf16>
    %3 = vector.extract_strided_slice %0 {offsets = [0, 1, 0, 0, 0], sizes = [2, 1, 8, 8, 128], strides = [1, 1, 1, 1, 1]} : vector<2x4x9x9x128xbf16> to vector<2x1x8x8x128xbf16>
    %4 = vector.shape_cast %3 : vector<2x1x8x8x128xbf16> to vector<2x8x8x128xbf16>
    %5 = vector.extract_strided_slice %0 {offsets = [0, 0, 0, 1, 0], sizes = [2, 1, 8, 8, 128], strides = [1, 1, 1, 1, 1]} : vector<2x4x9x9x128xbf16> to vector<2x1x8x8x128xbf16>
    %6 = vector.shape_cast %5 : vector<2x1x8x8x128xbf16> to vector<2x8x8x128xbf16>
    %7 = vector.extract_strided_slice %0 {offsets = [0, 2, 0, 0, 0], sizes = [2, 1, 8, 8, 128], strides = [1, 1, 1, 1, 1]} : vector<2x4x9x9x128xbf16> to vector<2x1x8x8x128xbf16>
    %8 = vector.shape_cast %7 : vector<2x1x8x8x128xbf16> to vector<2x8x8x128xbf16>
    %9 = vector.extract_strided_slice %0 {offsets = [0, 3, 0, 0, 0], sizes = [2, 1, 8, 8, 128], strides = [1, 1, 1, 1, 1]} : vector<2x4x9x9x128xbf16> to vector<2x1x8x8x128xbf16>
    %10 = vector.shape_cast %9 : vector<2x1x8x8x128xbf16> to vector<2x8x8x128xbf16>
    %11 = vector.extract_strided_slice %0 {offsets = [0, 2, 0, 1, 0], sizes = [2, 1, 8, 8, 128], strides = [1, 1, 1, 1, 1]} : vector<2x4x9x9x128xbf16> to vector<2x1x8x8x128xbf16>
    %12 = vector.shape_cast %11 : vector<2x1x8x8x128xbf16> to vector<2x8x8x128xbf16>
    %13 = vector.extract_strided_slice %0 {offsets = [0, 0, 1, 0, 0], sizes = [2, 1, 8, 8, 128], strides = [1, 1, 1, 1, 1]} : vector<2x4x9x9x128xbf16> to vector<2x1x8x8x128xbf16>
    %14 = vector.shape_cast %13 : vector<2x1x8x8x128xbf16> to vector<2x8x8x128xbf16>
    %15 = vector.extract_strided_slice %0 {offsets = [0, 1, 1, 0, 0], sizes = [2, 1, 8, 8, 128], strides = [1, 1, 1, 1, 1]} : vector<2x4x9x9x128xbf16> to vector<2x1x8x8x128xbf16>
    %16 = vector.shape_cast %15 : vector<2x1x8x8x128xbf16> to vector<2x8x8x128xbf16>
    %17 = vector.extract_strided_slice %0 {offsets = [0, 0, 1, 1, 0], sizes = [2, 1, 8, 8, 128], strides = [1, 1, 1, 1, 1]} : vector<2x4x9x9x128xbf16> to vector<2x1x8x8x128xbf16>
    %18 = vector.shape_cast %17 : vector<2x1x8x8x128xbf16> to vector<2x8x8x128xbf16>
    %19 = tpu.concatenate %2, %4, %6, %8, %10, %12, %14, %16, %18 in 3 : vector<2x8x8x128xbf16>, vector<2x8x8x128xbf16>, vector<2x8x8x128xbf16>, vector<2x8x8x128xbf16>, vector<2x8x8x128xbf16>, vector<2x8x8x128xbf16>, vector<2x8x8x128xbf16>, vector<2x8x8x128xbf16>, vector<2x8x8x128xbf16> -> vector<2x8x8x1152xbf16>
    %20 = vector.shape_cast %19 : vector<2x8x8x1152xbf16> to vector<128x1152xbf16>
    %c0_4 = arith.constant 0 : index
    %c0_5 = arith.constant 0 : index
    %21 = vector.load %arg2[%c0_4, %c0_5] : memref<1152x128xbf16, #tpu.memory_space<vmem>>, vector<1152x128xbf16>
    %cst = arith.constant dense<0.000000e+00> : vector<128x128xf32>
    %22 = tpu.matmul %20, %21, %cst {dimension_numbers = #tpu.dot_dimension_numbers<[1], [0], [0], [1], [0, 0, 1, 1], [], []>} : vector<128x1152xbf16>, vector<1152x128xbf16>, vector<128x128xf32> -> vector<128x128xf32>
    %c0_6 = arith.constant 0 : index
    %c0_7 = arith.constant 0 : index
    %23 = vector.load %arg3[%c0_6, %c0_7] : memref<1x128xf32, #tpu.memory_space<vmem>>, vector<1x128xf32>
    %24 = vector.broadcast %23 : vector<1x128xf32> to vector<128x128xf32>
    %25 = arith.addf %22, %24 : vector<128x128xf32>
    %26 = vector.shape_cast %25 : vector<128x128xf32> to vector<2x8x8x128xf32>
    %c0_8 = arith.constant 0 : index
    %c0_9 = arith.constant 0 : index
    %c0_10 = arith.constant 0 : index
    %c0_11 = arith.constant 0 : index
    %27 = vector.load %arg4[%c0_8, %c0_9, %c0_10, %c0_11] : memref<2x8x8x128xf32, #tpu.memory_space<vmem>>, vector<2x8x8x128xf32>
    tpu.vector_store %arg4[%c0_8, %c0_9, %c0_10, %c0_11], %26 {strides = array<i32>} : memref<2x8x8x128xf32, #tpu.memory_space<vmem>>, vector<2x8x8x128xf32>,
    return
  }
  func.func @transform_0(%arg0: i32) -> (i32, i32, i32, i32, i32) {
    %c0_i32 = arith.constant 0 : i32
    %c0_i32_0 = arith.constant 0 : i32
    %c0_i32_1 = arith.constant 0 : i32
    %c0_i32_2 = arith.constant 0 : i32
    %c0_i32_3 = arith.constant 0 : i32
    return %arg0, %c0_i32, %c0_i32_0, %c0_i32_1, %c0_i32_2 : i32, i32, i32, i32, i32
  }
  func.func @transform_1(%arg0: i32) -> (i32, i32) {
    %c0_i32 = arith.constant 0 : i32
    %c0_i32_0 = arith.constant 0 : i32
    %c0_i32_1 = arith.constant 0 : i32
    return %c0_i32, %c0_i32_0 : i32, i32
  }
  func.func @transform_2(%arg0: i32) -> (i32, i32) {
    %c0_i32 = arith.constant 0 : i32
    %c0_i32_0 = arith.constant 0 : i32
    %c0_i32_1 = arith.constant 0 : i32
    return %c0_i32, %c0_i32_0 : i32, i32
  }
  func.func @transform_3(%arg0: i32) -> (i32, i32, i32, i32) {
    %c0_i32 = arith.constant 0 : i32
    %c0_i32_0 = arith.constant 0 : i32
    %c0_i32_1 = arith.constant 0 : i32
    %c0_i32_2 = arith.constant 0 : i32
    return %arg0, %c0_i32, %c0_i32_0, %c0_i32_1 : i32, i32, i32, i32
  }
}

</mosaic_0001>

<bundles_post_ra>
// kernel: tpu_custom_call.1
= control target key start
LH: loop header
LB: loop body
LE: loop exit
PB: predicated region body
PF: predicated region fallthrough
CT: control target
= control target key end

     0   :  { %8 = vsyncpa [#allocation3], 0  ;;  %s3738_s0 = inlined_call_operand.vmem [shape: bf16[4,4,9,9,128], index: 0, kind: input, shape index: {}]   ;;  %s3739_s1 = inlined_call_operand.vmem [shape: bf16[1152,128], index: 1, kind: input, shape index: {}]   ;;  %s3740_s2 = inlined_call_operand.vmem [shape: f32[1,128], index: 2, kind: input, shape index: {}]   ;;  %s3741_s3 = inlined_call_operand.hbm [shape: f32[4,8,8,128], index: 3, kind: output, shape index: {}]  }
   0x1   :  { %10 = vsyncpa [#allocation3 + $0x1], 0  ;;  %s2890_s12 = smov 0   ;;  %s2892_s13 = smov 0  }
   0x2   :  { %s2894_s14 = smov 0   ;;  %s2896_s15 = smov 0  }
   0x3 LB: > { %s2911_s16 = sadd.s32 4294967295, %s2865_s15   ;;  %s2093_s17 = sadd.s32 4294967294, %s2865_s15   ;;  %s2865_s15 = sphi %s2896_s15, %s3797_s15   ;;  %s2861_s14 = sphi %s2894_s14, %s3796_s14   ;;  %s2857_s13 = sphi %s2892_s13, %s3795_s13   ;;  %s2853_s12 = sphi %s2890_s12, %s3794_s12  }
   0x4   : > { %s2915_s18 = sadd.s32 1, %s2865_s15   ;;  %s91_s19 = sadd.s32 1, %s2861_s14 }
   0x5   : > { %s88_s20 = ssub.s32 %s2865_s15, %s2915_s18  ;;  %p101_p0 = scmp.ne.s32.totalorder %s2861_s14, %s2857_s13 }
   0x6   : > { %p89_p1 = scmp.eq.s32.totalorder %s88_s20, 0  ;;  %p102_p2 = scmp.eq.s32.totalorder %s2911_s16, 1 }
   0x7   : > { %p107_p3 = scmp.ne.s32.totalorder %s2857_s13, %s2853_s12  ;;  %p108_p4 = scmp.eq.s32.totalorder %s2093_s17, 1 }
   0x8   : > { %s2926_s21 = scalar_select %p89_p1, %s2861_s14, %s91_s19  }
   0x9   : > { %p2928_p5 = por %p102_p2, %p101_p0  ;;  %p2932_p6 = por %p108_p4, %p107_p3 }
   0xa   : > { %p2096_p7 = scmp.ge.s32.totalorder %s2865_s15, 1  ;;  %p142_p8 = scmp.lt.s32.totalorder %s2865_s15, 3 }
   0xc   : > { %p143_p9 = pnand %p2096_p7, %p142_p8 }
   0xe   : > { %146 = sbr.rel (%p143_p9) target bundleno = 427 (0x1ab), region = 32 }
  0x15   : > { %v2649_v0 = vld [vmem:[%s3739_s1 + $0x40] sm:$0xff]   ;;  %v2653_v4 = vld [vmem:[%s3739_s1 + $0x48] sm:$0xff]   ;;  %v2657_v8 = vld [vmem:[%s3739_s1 + $0x50] sm:$0xff]   ;;  %s2098_s19 = sshll.u32 %s2911_s16, 1  ;;  %s164_s8 = sand.u32 1, %s2857_s13  }
  0x16   : > { %v2650_v1 = vld [vmem:[%s3739_s1 + $0xc0] sm:$0xff]   ;;  %2287 = vmatprep.subr.bf16.mxu0 %v2649_v0  ;;  %v2654_v5 = vld [vmem:[%s3739_s1 + $0xc8] sm:$0xff]   ;;  %v2658_v9 = vld [vmem:[%s3739_s1 + $0xd0] sm:$0xff]   ;;  %p168_p10 = scmp.lt.s32.totalorder %s2098_s19, 3  ;;  %s2097_s9 = sshll.u32 %s164_s8, 7 }
  0x17   : > { %v2651_v2 = vld [vmem:[%s3739_s1] sm:$0xff]   ;;  %2351 = vmatprep.subr.bf16.mxu1 %v2650_v1  ;;  %v2655_v6 = vld [vmem:[%s3739_s1 + $0x8] sm:$0xff]   ;;  %v2659_v10 = vld [vmem:[%s3739_s1 + $0x10] sm:$0xff]   ;;  %s2286_s10 = sshll.u32 %s2911_s16, 11  ;;  %s3697_s16 = scalar_lea.sflag [#allocation3], %s164_s8 }
  0x18   : > { %v2652_v3 = vld [vmem:[%s3739_s1 + $0x80] sm:$0xff]   ;;  %2288 = vmatpush3.bf16.msra.mxu0 %v2651_v2  ;;  %v2656_v7 = vld [vmem:[%s3739_s1 + $0x88] sm:$0xff]   ;;  %v2660_v11 = vld [vmem:[%s3739_s1 + $0x90] sm:$0xff]   ;;  %s3799_s19 = smov (!%p168_p10, %s2098_s19), 3  ;;  %s3688_s25 = scalar_lea.hbm %s3741_s3, %s2286_s10 }
  0x19   : > { %2352 = vmatpush3.bf16.msra.mxu1 %v2652_v3  ;;  %2289 = vmatprep.subr.bf16.mxu0 %v2653_v4  ;;  %v2661_v12 = vld [vmem:[%s3739_s1 + $0x58] sm:$0xff]   ;;  %v2665_v16 = vld [vmem:[%s3739_s1 + $0x60] sm:$0xff]   ;;  %v2669_v20 = vld [vmem:[%s3739_s1 + $0x68] sm:$0xff]   ;;  %s2607_s28 = smul.u32 288, %s3799_s19  ;;  %s3660_s19 = scalar_lea.vmem [#allocation2], %s2097_s9 }
  0x1a   : > { %2353 = vmatprep.subr.bf16.mxu1 %v2654_v5  ;;  %v2662_v13 = vld [vmem:[%s3739_s1 + $0xd8] sm:$0xff]   ;;  %v2666_v17 = vld [vmem:[%s3739_s1 + $0xe0] sm:$0xff]   ;;  %v2670_v21 = vld [vmem:[%s3739_s1 + $0xe8] sm:$0xff]   ;;  %s2031_s17 = sshll.u32 %s3660_s19, 4  ;;  %s2867_s27 = smov [#allocation2]   ;;  %s3690_s17 = int_to_ptr.vmem [resolvable:$true] %s2031_s17 }
  0x1b   : > { %v2663_v14 = vld [vmem:[%s3739_s1 + $0x18] sm:$0xff]   ;;  %v2667_v18 = vld [vmem:[%s3739_s1 + $0x20] sm:$0xff]   ;;  %v2671_v22 = vld [vmem:[%s3739_s1 + $0x28] sm:$0xff]   ;;  %s3038_s11 = scalar_lea.vmem %s3738_s0, %s2607_s28  ;;  %s2803_s26 = scalar_lea.vmem %s3690_s17, 2048 }
  0x1c   : > { %2290 = vmatpush3.bf16.msra.mxu0 %v2655_v6  ;;  %v2664_v15 = vld [vmem:[%s3739_s1 + $0x98] sm:$0xff]   ;;  %v2668_v19 = vld [vmem:[%s3739_s1 + $0xa0] sm:$0xff]   ;;  %v2672_v23 = vld [vmem:[%s3739_s1 + $0xa8] sm:$0xff]   ;;  %p2804_p11 = scmp.ne.s32.totalorder %s3690_s17, %s2803_s26  ;;  %s2807_s28 = sshll.u32 %s2867_s27, 4  ;;  %s2808_s28 = int_to_ptr.vmem [resolvable:$false] %s2807_s28 }
  0x1d   : > { %2354 = vmatpush3.bf16.msra.mxu1 %v2656_v7  ;;  %2291 = vmatprep.subr.bf16.mxu0 %v2657_v8  ;;  %v2673_v24 = vld [vmem:[%s3739_s1 + $0x70] sm:$0xff]   ;;  %v2677_v28 = vld [vmem:[%s3739_s1 + $0x78] sm:$0xff]   ;;  %v194_v32 = vld [vmem:[%s3038_s11 + $0x48] sm:$0xf]  ;;  %s2809_s29 = scalar_lea.vmem %s2808_s28, 4096  ;;  %p2810_p0 = scmp.lt.s32.totalorder %s3690_s17, %s2808_s28 }
  0x1e   : > { %2355 = vmatprep.subr.bf16.mxu1 %v2658_v9  ;;  %v2674_v25 = vld [vmem:[%s3739_s1 + $0xf0] sm:$0xff]   ;;  %v2678_v29 = vld [vmem:[%s3739_s1 + $0xf8] sm:$0xff]   ;;  %v176_v38 = vld [vmem:[%s3038_s11] sm:$0xf]  ;;  %p2805_p12 = pnand %p2804_p11, %p2928_p5  ;;  %p2811_p1 = scmp.lt.s32.totalorder %s2809_s29, %s2803_s26 }
  0x1f   : > { %v2675_v26 = vld [vmem:[%s3739_s1 + $0x30] sm:$0xff]   ;;  %v2679_v30 = vld [vmem:[%s3739_s1 + $0x38] sm:$0xff]   ;;  %v177_v39 = vld [vmem:[%s3038_s11 + $0x4] sm:$0x1] }
  0x20   : > { %2292 = vmatpush3.bf16.msra.mxu0 %v2659_v10  ;;  %v2676_v27 = vld [vmem:[%s3739_s1 + $0xb0] sm:$0xff]   ;;  %v2680_v31 = vld [vmem:[%s3739_s1 + $0xb8] sm:$0xff]   ;;  %v3056_v40 = vld [vmem:[%s3038_s11 + $0x8] sm:$0xf]  ;;  %v2100_v42 = vcombine.low %v176_v38, %v177_v39  ;;  %p2806_p13 = pneg %p2805_p12  ;;  %p2812_p2 = por %p2811_p1, %p2810_p0 }
  0x21   : > { %2356 = vmatpush3.bf16.msra.mxu1 %v2660_v11  ;;  %2293 = vmatprep.subr.bf16.mxu0 %v2661_v12  ;;  %v3042_v33 = vld [vmem:[%s3038_s11 + $0x50] sm:$0xf]  ;;  %v3049_v36 = vld [vmem:[%s3038_s11 + $0x98] sm:$0xf]  ;;  %v179_v41 = vld [vmem:[%s3038_s11 + $0xc] sm:$0x1]  ;;  %v2135_v44 = vcombine.low %v176_v38, %v3056_v40 }
  0x22   : > { %2357 = vmatprep.subr.bf16.mxu1 %v2662_v13  ;;  %v2136_v34 = vcombine.low %v194_v32, %v3042_v33  ;;  %v3046_v35 = vld [vmem:[%s3038_s11 + $0x90] sm:$0xf]  ;;  %v2101_v43 = vcombine.low %v3056_v40, %v179_v41  ;;  %v2689_v45 = vld [vmem:[%s3739_s1 + $0x140] sm:$0xff]   ;;  %v3068_v47 = vld [vmem:[%s3038_s11 + $0x58] sm:$0xf]  ;;  %v361_v48 = vshll.u32 %v2100_v42, 16  ;;  %p2813_p3 = pnand %p2812_p2, %p2806_p13 }
  0x23   : > { %v2138_v37 = vcombine.low %v3046_v35, %v3049_v36  ;;  %v2690_v46 = vld [vmem:[%s3739_s1 + $0x1c0] sm:$0xff]   ;;  %v359_v49 = vshrl.u32 %v2100_v42, 16  ;;  %v3087_v61 = vld [vmem:[%s3038_s11 + $0xa8] sm:$0xf]  ;;  %v3090_v62 = vld [vmem:[%s3038_s11 + $0x10] sm:$0xf] }
  0x24   : > { %2294 = vmatpush3.bf16.msra.mxu0 %v2663_v14  ;;  %1547 = vmatprep.mubr.bf16.mxu0 %v2136_v34  ;;  %v366_v50 = vshrl.u32 %v2101_v43, 16  ;;  %v368_v51 = vshll.u32 %v2101_v43, 16  ;;  %v2691_v52 = vld [vmem:[%s3739_s1 + $0x100] sm:$0xff]   ;;  %v363_v53 = vrot.slane %v361_v48, 1  ;;  %v181_v0 = vld [vmem:[%s3038_s11 + $0x14] sm:$0x1] }
  0x25   : > { %2358 = vmatpush3.bf16.msra.mxu1 %v2664_v15  ;;  %2295 = vmatprep.subr.bf16.mxu0 %v2665_v16  ;;  %v3074_v56 = vld [vmem:[%s3038_s11 + $0x60] sm:$0xf]  ;;  %v3096_v1 = vld [vmem:[%s3038_s11 + $0x18] sm:$0xf]  ;;  %v183_v2 = vld [vmem:[%s3038_s11 + $0x1c] sm:$0x1]  ;;  %v2102_v5 = vcombine.low %v3090_v62, %v181_v0 }
  0x26   : > { %2359 = vmatprep.subr.bf16.mxu1 %v2666_v17  ;;  %1644 = vmatprep.mubr.bf16.mxu1 %v2138_v37  ;;  %v370_v54 = vrot.slane %v368_v51, 1  ;;  %v364_v55 = vor.u32 %v363_v53, %v359_v49  ;;  %v3077_v57 = vld [vmem:[%s3038_s11 + $0xa0] sm:$0xf]  ;;  %v2145_v60 = vcombine.low %v3068_v47, %v3074_v56  ;;  %v2103_v6 = vcombine.low %v3096_v1, %v183_v2  ;;  %v2701_v7 = vld [vmem:[%s3739_s1 + $0x148] sm:$0xff]   ;;  %v2713_v43 = vld [vmem:[%s3739_s1 + $0x1d0] sm:$0xff]  }
  0x27   : > { %v2692_v59 = vld [vmem:[%s3739_s1 + $0x180] sm:$0xff]   ;;  %v2147_v63 = vcombine.low %v3077_v57, %v3087_v61  ;;  %v2144_v8 = vcombine.low %v3090_v62, %v3096_v1  ;;  %v2702_v9 = vld [vmem:[%s3739_s1 + $0x1c8] sm:$0xff]   ;;  %v373_v10 = vshrl.u32 %v2102_v5, 16  ;;  %v375_v11 = vshll.u32 %v2102_v5, 16  ;;  %v2715_v49 = vld [vmem:[%s3739_s1 + $0x190] sm:$0xff]  }
  0x28   : > { %2296 = vmatpush3.bf16.msra.mxu0 %v2667_v18  ;;  %v3079_v58 = vor.u32 %v370_v54, %v366_v50  ;;  %v380_v12 = vshrl.u32 %v2103_v6, 16  ;;  %v382_v13 = vshll.u32 %v2103_v6, 16  ;;  %v2703_v14 = vld [vmem:[%s3739_s1 + $0x108] sm:$0xff]   ;;  %v2712_v18 = vld [vmem:[%s3739_s1 + $0x150] sm:$0xff]   ;;  %v3169_v50 = vld [vmem:[%s3038_s11 + $0x78] sm:$0xf] }
  0x29   : > { %2360 = vmatpush3.bf16.msra.mxu1 %v2668_v19  ;;  %2297 = vmatprep.subr.bf16.mxu0 %v2669_v20  ;;  %v377_v15 = vrot.slane %v375_v11, 1  ;;  %v2704_v17 = vld [vmem:[%s3739_s1 + $0x188] sm:$0xff]   ;;  %v3125_v20 = vld [vmem:[%s3038_s11 + $0x70] sm:$0xf]  ;;  %v3175_v53 = vld [vmem:[%s3038_s11 + $0xc0] sm:$0xf] }
  0x2a   : > { %2361 = vmatprep.subr.bf16.mxu1 %v2670_v21  ;;  %3756 = vst [vmem:[#allocation5_spill] sm:$0xff] %v3079_v58  ;;  %v2137_v4 = vcombine.low %v364_v55, %v3079_v58  ;;  %v384_v16 = vrot.slane %v382_v13, 1  ;;  %v3122_v19 = vld [vmem:[%s3038_s11 + $0x68] sm:$0xf]  ;;  %v3128_v21 = vld [vmem:[%s3038_s11 + $0xb0] sm:$0xf] }
  0x2b   : > { %v2723_v54 = vld [vmem:[%s3739_s1 + $0x158] sm:$0xff]   ;;  %v3192_v2 = vld [vmem:[%s3038_s11 + $0x30] sm:$0xf]  ;;  %v204_v11 = vld [vmem:[%s3038_s11 + $0x94] sm:$0x1] }
  0x2c   : > { %2298 = vmatpush3.bf16.msra.mxu0 %v2671_v22  ;;  %v3130_v22 = vor.u32 %v377_v15, %v373_v10  ;;  %v3196_v5 = vld [vmem:[%s3038_s11 + $0x38] sm:$0xf]  ;;  %v3324_v6 = vld [vmem:[%s3038_s11 + $0x190] sm:$0xf]  ;;  %v3346_v10 = vld [vmem:[%s3038_s11 + $0x140] sm:$0xf] }
  0x2d   : > { %2362 = vmatpush3.bf16.msra.mxu1 %v2672_v23  ;;  %2299 = vmatprep.subr.bf16.mxu0 %v2673_v24  ;;  %v3132_v23 = vor.u32 %v384_v16, %v380_v12  ;;  %v2154_v24 = vcombine.low %v3122_v19, %v3125_v20  ;;  %v2724_v16 = vld [vmem:[%s3739_s1 + $0x1d8] sm:$0xff]   ;;  %v3350_v37 = vld [vmem:[%s3038_s11 + $0x148] sm:$0xf] }
  0x2e   : > { %2363 = vmatprep.subr.bf16.mxu1 %v2674_v25  ;;  %3757 = vst [vmem:[#allocation6_spill] sm:$0xff] %v3130_v22  ;;  %v3137_v25 = vld [vmem:[%s3038_s11 + $0xb8] sm:$0xf]  ;;  %v2189_v3 = vcombine.low %v3346_v10, %v3350_v37 }
  0x2f   : > { %3758 = vst [vmem:[#allocation7_spill] sm:$0xff] %v3132_v23 }
  0x30   : > { %2300 = vmatpush3.bf16.msra.mxu0 %v2675_v26  ;;  %v2156_v26 = vcombine.low %v3128_v21, %v3137_v25 }
  0x31   : > { %2364 = vmatpush3.bf16.msra.mxu1 %v2676_v27  ;;  %2301 = vmatprep.subr.bf16.mxu0 %v2677_v28  ;;  %v3142_v27 = vld [vmem:[%s3038_s11 + $0x20] sm:$0xf]  ;;  %v185_v28 = vld [vmem:[%s3038_s11 + $0x24] sm:$0x1] }
  0x32   : > { %2365 = vmatprep.subr.bf16.mxu1 %v2678_v29  ;;  %v3146_v29 = vld [vmem:[%s3038_s11 + $0x28] sm:$0xf]  ;;  %v2104_v32 = vcombine.low %v3142_v27, %v185_v28  ;;  %v2726_v28 = vld [vmem:[%s3739_s1 + $0x198] sm:$0xff]  }
  0x33   : > { %v2153_v34 = vcombine.low %v3142_v27, %v3146_v29 }
  0x34   : > { %2302 = vmatpush3.bf16.msra.mxu0 %v2679_v30  ;;  %v2146_v30 = vcombine.low %v3130_v22, %v3132_v23  ;;  %v387_v41 = vshrl.u32 %v2104_v32, 16  ;;  %v389_v42 = vshll.u32 %v2104_v32, 16 }
  0x35   : > { %2366 = vmatpush3.bf16.msra.mxu1 %v2680_v31  ;;  %2415 = vmatprep.subr.bf16.mxu0 %v2689_v45  ;;  %v187_v31 = vld [vmem:[%s3038_s11 + $0x2c] sm:$0x1] }
  0x36   : > { %2479 = vmatprep.subr.bf16.mxu1 %v2690_v46  ;;  %v2105_v38 = vcombine.low %v3146_v29, %v187_v31  ;;  %v391_v48 = vrot.slane %v389_v42, 1  ;;  %v3221_v31 = vcombine.low %v3046_v35, %v204_v11  ;;  %v206_v35 = vld [vmem:[%s3038_s11 + $0x9c] sm:$0x1] }
  0x37   : > { %1548 = vmatmul.mubr.bf16.vlgmr.msra.gmra.mrb[0].mxu0 %v2135_v44  ;;  %v2714_v44 = vld [vmem:[%s3739_s1 + $0x110] sm:$0xff]  }
  0x38   : > { %2416 = vmatpush3.bf16.msra.mxu0 %v2691_v52  ;;  %1555 = vmatprep.mubr.bf16.mxu0 %v2145_v60  ;;  %v394_v45 = vshrl.u32 %v2105_v38, 16  ;;  %v396_v46 = vshll.u32 %v2105_v38, 16  ;;  %v3172_v52 = vld [vmem:[%s3038_s11 + $0x80] sm:$0xf]  ;;  %v3180_v55 = vor.u32 %v391_v48, %v387_v41  ;;  %v3185_v60 = vld [vmem:[%s3038_s11 + $0xc8] sm:$0xf] }
  0x39   : > { %1645 = vmatmul.mubr.bf16.vlgmr.msra.gmra.mrb[0].mxu1 %v2137_v4  ;;  %2417 = vmatprep.subr.bf16.mxu0 %v2701_v7  ;;  %v2165_v0 = vcombine.low %v3175_v53, %v3185_v60  ;;  %v189_v4 = vld [vmem:[%s3038_s11 + $0x34] sm:$0x1]  ;;  %v191_v7 = vld [vmem:[%s3038_s11 + $0x3c] sm:$0x1]  ;;  %v3227_v38 = vld [vmem:[%s3038_s11 + $0x1b0] sm:$0xf] }
  0x3a   : > { %2480 = vmatpush3.bf16.msra.mxu1 %v2692_v59  ;;  %1652 = vmatprep.mubr.bf16.mxu1 %v2147_v63  ;;  %v398_v51 = vrot.slane %v396_v46, 1  ;;  %3759 = vst [vmem:[#allocation8_spill] sm:$0xff] %v3180_v55  ;;  %v2163_v59 = vcombine.low %v3169_v50, %v3172_v52  ;;  %v2107_v13 = vcombine.low %v3196_v5, %v191_v7  ;;  %v2734_v41 = vld [vmem:[%s3739_s1 + $0x160] sm:$0xff]   ;;  %v553_v7 = vshll.u32 %v3221_v31, 16 }
  0x3b   : > { %2481 = vmatprep.subr.bf16.mxu1 %v2702_v9  ;;  %v2162_v9 = vcombine.low %v3192_v2, %v3196_v5  ;;  %v227_v46 = vld [vmem:[%s3038_s11 + $0x120] sm:$0xf]  ;;  %v228_v48 = vld [vmem:[%s3038_s11 + $0x124] sm:$0x1] }
  0x3c   : > { %2418 = vmatpush3.bf16.msra.mxu0 %v2703_v14  ;;  %v3187_v63 = vor.u32 %v398_v51, %v394_v45 }
  0x3d   : > { %2419 = vmatprep.subr.bf16.mxu0 %v2712_v18  ;;  %v408_v18 = vshrl.u32 %v2107_v13, 16 }
  0x3e   : > { %2482 = vmatpush3.bf16.msra.mxu1 %v2704_v17  ;;  %3760 = vst [vmem:[#allocation9_spill] sm:$0xff] %v3187_v63  ;;  %v2155_v12 = vcombine.low %v3180_v55, %v3187_v63  ;;  %v2725_v17 = vld [vmem:[%s3739_s1 + $0x118] sm:$0xff]  }
  0x3f   : > { %1556 = vmatmul.mubr.bf16.gmra.mrb[4].mxu0 %v2144_v8  ;;  %2483 = vmatprep.subr.bf16.mxu1 %v2713_v43  ;;  %v2106_v8 = vcombine.low %v3192_v2, %v189_v4 }
  0x40   : > { %1563 = vmatprep.mubr.bf16.mxu0 %v2154_v24  ;;  %2420 = vmatpush3.bf16.msra.mxu0 %v2714_v44  ;;  %v410_v24 = vshll.u32 %v2107_v13, 16  ;;  %v3236_v44 = vld [vmem:[%s3038_s11 + $0x1b8] sm:$0xf]  ;;  %v2735_v13 = vld [vmem:[%s3739_s1 + $0x1e0] sm:$0xff]  }
  0x41   : > { %1653 = vmatmul.mubr.bf16.gmra.mrb[4].mxu1 %v2146_v30  ;;  %2421 = vmatprep.subr.bf16.mxu0 %v2723_v54  ;;  %v401_v14 = vshrl.u32 %v2106_v8, 16  ;;  %v403_v15 = vshll.u32 %v2106_v8, 16  ;;  %v245_v30 = vld [vmem:[%s3038_s11 + $0x168] sm:$0xf]  ;;  %v2174_v51 = vcombine.low %v3227_v38, %v3236_v44  ;;  %v230_v54 = vld [vmem:[%s3038_s11 + $0x12c] sm:$0x1] }
  0x42   : > { %1660 = vmatprep.mubr.bf16.mxu1 %v2156_v26  ;;  %2484 = vmatpush3.bf16.msra.mxu1 %v2715_v49  ;;  %v412_v32 = vrot.slane %v410_v24, 1  ;;  %v3244_v49 = vld [vmem:[%s3038_s11 + $0x128] sm:$0xf]  ;;  %v2737_v24 = vld [vmem:[%s3739_s1 + $0x1a0] sm:$0xff]  }
  0x43   : > { %v405_v26 = vrot.slane %v403_v15, 1  ;;  %2485 = vmatprep.subr.bf16.mxu1 %v2724_v16 }
  0x44   : > { %2422 = vmatpush3.bf16.msra.mxu0 %v2725_v17  ;;  %v3239_v45 = vor.u32 %v412_v32, %v408_v18  ;;  %v3263_v17 = vcombine.low %v3049_v36, %v206_v35  ;;  %v3275_v36 = vld [vmem:[%s3038_s11 + $0x1c0] sm:$0xf]  ;;  %v2745_v32 = vld [vmem:[%s3739_s1 + $0x168] sm:$0xff]   ;;  %v208_v35 = vld [vmem:[%s3038_s11 + $0xa4] sm:$0x1] }
  0x45   : > { %v3232_v42 = vor.u32 %v405_v26, %v401_v14  ;;  %2423 = vmatprep.subr.bf16.mxu0 %v2734_v41  ;;  %v2736_v14 = vld [vmem:[%s3739_s1 + $0x120] sm:$0xff]   ;;  %v3269_v26 = vld [vmem:[%s3038_s11 + $0x178] sm:$0xf] }
  0x46   : > { %2486 = vmatpush3.bf16.msra.mxu1 %v2726_v28  ;;  %3762 = vst [vmem:[#allocation11_spill] sm:$0xff] %v3239_v45 }
  0x47   : > { %1564 = vmatmul.mubr.bf16.gmra.mrb[8].mxu0 %v2153_v34  ;;  %v3224_v34 = vld [vmem:[%s3038_s11 + $0x170] sm:$0xf]  ;;  %3761 = vst [vmem:[#allocation10_spill] sm:$0xff] %v3232_v42  ;;  %v2164_v8 = vcombine.low %v3232_v42, %v3239_v45  ;;  %2487 = vmatprep.subr.bf16.mxu1 %v2735_v13 }
  0x48   : > { %1571 = vmatprep.mubr.bf16.mxu0 %v2163_v59  ;;  %v2172_v43 = vcombine.low %v245_v30, %v3224_v34  ;;  %v2108_v59 = vcombine.low %v227_v46, %v228_v48  ;;  %2424 = vmatpush3.bf16.msra.mxu0 %v2736_v14  ;;  %v3272_v30 = vld [vmem:[%s3038_s11 + $0x180] sm:$0xf]  ;;  %v2757_v45 = vld [vmem:[%s3739_s1 + $0x1f0] sm:$0xff]  }
  0x49   : > { %1661 = vmatmul.mubr.bf16.gmra.mrb[8].mxu1 %v2155_v12  ;;  %v2181_v48 = vcombine.low %v3269_v26, %v3272_v30  ;;  %2425 = vmatprep.subr.bf16.mxu0 %v2745_v32 }
  0x4a   : > { %1668 = vmatprep.mubr.bf16.mxu1 %v2165_v0  ;;  %v2171_v0 = vcombine.low %v227_v46, %v3244_v49  ;;  %v417_v11 = vshll.u32 %v2108_v59, 16  ;;  %v415_v12 = vshrl.u32 %v2108_v59, 16  ;;  %2488 = vmatpush3.bf16.msra.mxu1 %v2737_v24  ;;  %v3291_v59 = vld [vmem:[%s3038_s11 + $0x130] sm:$0xf] }
  0x4c   : > { %v419_v18 = vrot.slane %v417_v11, 1  ;;  %v234_v11 = vld [vmem:[%s3038_s11 + $0x13c] sm:$0x1] }
  0x4e   : > { %v420_v46 = vor.u32 %v419_v18, %v415_v12 }
  0x4f   : > { %1572 = vmatmul.mubr.bf16.gmra.mrb[12].mxu0 %v2162_v9  ;;  %v2109_v9 = vcombine.low %v3244_v49, %v230_v54 }
  0x50   : > { %1579 = vmatprep.mubr.bf16.mxu0 %v2172_v43 }
  0x51   : > { %1669 = vmatmul.mubr.bf16.gmra.mrb[12].mxu1 %v2164_v8  ;;  %v422_v15 = vshrl.u32 %v2109_v9, 16  ;;  %v424_v16 = vshll.u32 %v2109_v9, 16  ;;  %v3295_v8 = vld [vmem:[%s3038_s11 + $0x138] sm:$0xf] }
  0x52   : > { %1676 = vmatprep.mubr.bf16.mxu1 %v2174_v51  ;;  %v3286_v51 = vld [vmem:[%s3038_s11 + $0x1c8] sm:$0xf]  ;;  %v2180_v13 = vcombine.low %v3291_v59, %v3295_v8  ;;  %v2111_v24 = vcombine.low %v3295_v8, %v234_v11 }
  0x53   : > { %v426_v28 = vrot.slane %v424_v16, 1  ;;  %v2183_v9 = vcombine.low %v3275_v36, %v3286_v51  ;;  %v560_v16 = vshll.u32 %v3263_v17, 16  ;;  %v3321_v11 = vld [vmem:[%s3038_s11 + $0x188] sm:$0xf] }
  0x54   : > { %v438_v4 = vshll.u32 %v2111_v24, 16 }
  0x55   : > { %v3288_v54 = vor.u32 %v426_v28, %v422_v15  ;;  %v555_v15 = vrot.slane %v553_v7, 1  ;;  %v3309_v28 = vcombine.low %v3077_v57, %v208_v35  ;;  %v2747_v7 = vld [vmem:[%s3739_s1 + $0x128] sm:$0xff]  }
  0x56   : > { %v2748_v35 = vld [vmem:[%s3739_s1 + $0x1a8] sm:$0xff]   ;;  %2426 = vmatpush3.bf16.msra.mxu0 %v2747_v7 }
  0x57   : > { %1580 = vmatmul.mubr.bf16.gmra.mrb[16].mxu0 %v2171_v0  ;;  %3763 = vst [vmem:[#allocation12_spill] sm:$0xff] %v3288_v54  ;;  %v232_v0 = vld [vmem:[%s3038_s11 + $0x134] sm:$0x1]  ;;  %v2173_v18 = vcombine.low %v420_v46, %v3288_v54  ;;  %v436_v46 = vshrl.u32 %v2111_v24, 16  ;;  %v210_v24 = vld [vmem:[%s3038_s11 + $0xac] sm:$0x1] }
  0x58   : > { %1587 = vmatprep.mubr.bf16.mxu0 %v2181_v48  ;;  %v2110_v12 = vcombine.low %v3291_v59, %v232_v0  ;;  %v2746_v0 = vld [vmem:[%s3739_s1 + $0x1e8] sm:$0xff]   ;;  %v216_v54 = vld [vmem:[%s3038_s11 + $0xc4] sm:$0x1] }
  0x59   : > { %1677 = vmatmul.mubr.bf16.gmra.mrb[16].mxu1 %v2173_v18  ;;  %2489 = vmatprep.subr.bf16.mxu1 %v2746_v0  ;;  %v3327_v18 = vld [vmem:[%s3038_s11 + $0x1d0] sm:$0xf]  ;;  %v3339_v0 = vld [vmem:[%s3038_s11 + $0x1d8] sm:$0xf] }
  0x5a   : > { %v429_v32 = vshrl.u32 %v2110_v12, 16  ;;  %v431_v48 = vshll.u32 %v2110_v12, 16  ;;  %1684 = vmatprep.mubr.bf16.mxu1 %v2183_v9  ;;  %v440_v12 = vrot.slane %v438_v4, 1  ;;  %v2756_v9 = vld [vmem:[%s3739_s1 + $0x170] sm:$0xff]   ;;  %2490 = vmatpush3.bf16.msra.mxu1 %v2748_v35  ;;  %v2190_v4 = vcombine.low %v3321_v11, %v3324_v6 }
  0x5b   : > { %v2192_v14 = vcombine.low %v3327_v18, %v3339_v0  ;;  %2427 = vmatprep.subr.bf16.mxu0 %v2756_v9  ;;  %2491 = vmatprep.subr.bf16.mxu1 %v2757_v45  ;;  %v3405_v45 = vld [vmem:[%s3038_s11 + $0x1e8] sm:$0xf] }
  0x5c   : > { %v433_v57 = vrot.slane %v431_v48, 1  ;;  %v3341_v7 = vor.u32 %v440_v12, %v436_v46  ;;  %v214_v48 = vld [vmem:[%s3038_s11 + $0xbc] sm:$0x1]  ;;  %v2758_v12 = vld [vmem:[%s3739_s1 + $0x130] sm:$0xff]  }
  0x5d   : > { %2428 = vmatpush3.bf16.msra.mxu0 %v2758_v12 }
  0x5e   : > { %v3334_v39 = vor.u32 %v433_v57, %v429_v32  ;;  %3765 = vst [vmem:[#allocation14_spill] sm:$0xff] %v3341_v7  ;;  %v212_v32 = vld [vmem:[%s3038_s11 + $0xb4] sm:$0x1]  ;;  %v238_v57 = vld [vmem:[%s3038_s11 + $0x14c] sm:$0x1] }
  0x5f   : > { %1588 = vmatmul.mubr.bf16.gmra.mrb[20].mxu0 %v2180_v13  ;;  %v562_v13 = vrot.slane %v560_v16, 1  ;;  %v236_v16 = vld [vmem:[%s3038_s11 + $0x144] sm:$0x1]  ;;  %v2113_v9 = vcombine.low %v3350_v37, %v238_v57  ;;  %v3383_v55 = vcombine.low %v3128_v21, %v212_v32  ;;  %v3767_v21 = vshrl.u32 %v3263_v17, 16  ;;  %v3413_v17 = vld [vmem:[%s3038_s11 + $0x150] sm:$0xf] }
  0x60   : > { %3764 = vst [vmem:[#allocation13_spill] sm:$0xff] %v3334_v39  ;;  %1595 = vmatprep.mubr.bf16.mxu0 %v2190_v4  ;;  %v2112_v35 = vcombine.low %v3346_v10, %v236_v16  ;;  %v2182_v43 = vcombine.low %v3334_v39, %v3341_v7  ;;  %v3366_v4 = vcombine.low %v3087_v61, %v210_v24  ;;  %v2759_v61 = vld [vmem:[%s3739_s1 + $0x1b0] sm:$0xff]   ;;  %v3378_v24 = vld [vmem:[%s3038_s11 + $0x198] sm:$0xf]  ;;  %v565_v32 = vshrl.u32 %v3309_v28, 16 }
  0x61   : > { %v450_v46 = vshrl.u32 %v2113_v9, 16  ;;  %v452_v42 = vshll.u32 %v2113_v9, 16  ;;  %2492 = vmatpush3.bf16.msra.mxu1 %v2759_v61 }
  0x62   : > { %v443_v16 = vshrl.u32 %v2112_v35, 16  ;;  %v445_v41 = vshll.u32 %v2112_v35, 16  ;;  %1685 = vmatmul.mubr.bf16.gmra.mrb[20].mxu1 %v2182_v43  ;;  %v3766_v35 = vshrl.u32 %v3221_v31, 16  ;;  %v3386_v43 = vcombine.low %v3137_v25, %v214_v48  ;;  %v2767_v31 = vld [vmem:[%s3739_s1 + $0x178] sm:$0xff]  }
  0x63   : > { %1692 = vmatprep.mubr.bf16.mxu1 %v2192_v14  ;;  %v454_v14 = vrot.slane %v452_v42, 1  ;;  %v574_v25 = vshll.u32 %v3366_v4, 16  ;;  %2429 = vmatprep.subr.bf16.mxu0 %v2767_v31 }
  0x64   : > { %v447_v57 = vrot.slane %v445_v41, 1  ;;  %v556_v63 = vor.u32 %v555_v15, %v3766_v35  ;;  %v3392_v41 = vld [vmem:[%s3038_s11 + $0x1e0] sm:$0xf]  ;;  %v563_v15 = vor.u32 %v562_v13, %v3767_v21  ;;  %v240_v13 = vld [vmem:[%s3038_s11 + $0x154] sm:$0x1]  ;;  %v581_v21 = vshll.u32 %v3383_v55, 16 }
  0x65   : > { %v3408_v12 = vor.u32 %v454_v14, %v450_v46  ;;  %v2201_v9 = vcombine.low %v3392_v41, %v3405_v45  ;;  %v3417_v35 = vld [vmem:[%s3038_s11 + $0x158] sm:$0xf]  ;;  %v2114_v61 = vcombine.low %v3413_v17, %v240_v13  ;;  %v588_v23 = vshll.u32 %v3386_v43, 16 }
  0x66   : > { %v3400_v48 = vor.u32 %v447_v57, %v443_v16  ;;  %3769 = vst [vmem:[#allocation16_spill] sm:$0xff] %v3417_v35  ;;  %v242_v57 = vld [vmem:[%s3038_s11 + $0x15c] sm:$0x1]  ;;  %v2198_v46 = vcombine.low %v3413_v17, %v3417_v35  ;;  %v2140_v39 = vcombine.low %v556_v63, %v563_v15  ;;  %v2772_v63 = vld [vmem:[%s3739_s1 + $0x200] sm:$0xff]  }
  0x67   : > { %1596 = vmatmul.mubr.bf16.gmra.mrb[24].mxu0 %v2189_v3  ;;  %v3389_v3 = vld [vmem:[%s3038_s11 + $0x1a0] sm:$0xf]  ;;  %v2115_v16 = vcombine.low %v3417_v35, %v242_v57  ;;  %v459_v7 = vshll.u32 %v2114_v61, 16  ;;  %v2768_v13 = vld [vmem:[%s3739_s1 + $0x1f8] sm:$0xff]  }
  0x68   : > { %3768 = vst [vmem:[#allocation15_spill] sm:$0xff] %v3400_v48  ;;  %v2199_v42 = vcombine.low %v3378_v24, %v3389_v3  ;;  %v2191_v31 = vcombine.low %v3400_v48, %v3408_v12  ;;  %v2769_v14 = vld [vmem:[%s3739_s1 + $0x138] sm:$0xff]   ;;  %2493 = vmatprep.subr.bf16.mxu1 %v2768_v13 }
  0x69   : > { %v464_v22 = vshrl.u32 %v2115_v16, 16  ;;  %v466_v58 = vshll.u32 %v2115_v16, 16  ;;  %v461_v48 = vrot.slane %v459_v7, 1  ;;  %v2770_v57 = vld [vmem:[%s3739_s1 + $0x1b8] sm:$0xff]   ;;  %2430 = vmatpush3.bf16.msra.mxu0 %v2769_v14  ;;  %v572_v16 = vshrl.u32 %v3366_v4, 16 }
  0x6a   : > { %1603 = vmatprep.mubr.bf16.mxu0 %v2199_v42  ;;  %v457_v42 = vshrl.u32 %v2114_v61, 16  ;;  %1693 = vmatmul.mubr.bf16.gmra.mrb[24].mxu1 %v2191_v31  ;;  %v218_v61 = vld [vmem:[%s3038_s11 + $0xcc] sm:$0x1]  ;;  %v2142_v14 = vcombine.low %v3042_v33, %v3068_v47  ;;  %v2122_v31 = vcombine.low %v3175_v53, %v216_v54  ;;  %v2771_v13 = vld [vmem:[%s3038_s11 + $0xd8] ss:$8 sps:$4 sm:$0xff]   ;;  %v579_v33 = vshrl.u32 %v3383_v55, 16 }
  0x6b   : > { %1700 = vmatprep.mubr.bf16.mxu1 %v2201_v9  ;;  %v468_v35 = vrot.slane %v466_v58, 1  ;;  %2494 = vmatpush3.bf16.msra.mxu1 %v2770_v57  ;;  %v3770_v9 = vshll.u32 %v3309_v28, 16  ;;  %v576_v58 = vrot.slane %v574_v25, 1  ;;  %v2123_v28 = vcombine.low %v3185_v60, %v218_v61  ;;  %v2776_v25 = vld [vmem:[%s3739_s1 + $0x208] sm:$0xff]   ;;  %v255_v60 = vld [vmem:[%s3038_s11 + $0x1b4] sm:$0x1] }
  0x6c   : > { %v3446_v15 = vor.u32 %v461_v48, %v457_v42  ;;  %2559 = vmatprep.subr.bf16.mxu0 %v2772_v63  ;;  %2591 = vmatprep.subr.bf16.mxu1 %v2772_v63  ;;  %v583_v47 = vrot.slane %v581_v21, 1  ;;  %v586_v53 = vshrl.u32 %v3386_v43, 16  ;;  %v590_v54 = vrot.slane %v588_v23, 1  ;;  %v257_v42 = vld [vmem:[%s3038_s11 + $0x1bc] sm:$0x1]  ;;  %v2780_v55 = vld [vmem:[%s3739_s1 + $0x210] sm:$0xff]  }
  0x6d   : > { %v569_v7 = vrot.slane %v3770_v9, 1  ;;  %v577_v4 = vor.u32 %v576_v58, %v572_v16  ;;  %v602_v57 = vshll.u32 %v2123_v28, 16  ;;  %v2151_v23 = vcombine.low %v3074_v56, %v3122_v19  ;;  %v2774_v43 = vld [vmem:[%s3038_s11 + $0xe8] ss:$8 sps:$4 sm:$0xff]   ;;  %v2785_v56 = vld [vmem:[%s3739_s1 + $0x218] sm:$0xff]  }
  0x6e   : > { %v584_v61 = vor.u32 %v583_v47, %v579_v33  ;;  %v591_v9 = vor.u32 %v590_v54, %v586_v53  ;;  %v2124_v21 = vcombine.low %v3227_v38, %v255_v60  ;;  %v593_v16 = vshrl.u32 %v2122_v31, 16 }
  0x6f   : > { %1604 = vmatmul.mubr.bf16.gmra.mrb[28].mxu0 %v2198_v46  ;;  %v3451_v46 = vor.u32 %v468_v35, %v464_v22  ;;  %v570_v48 = vor.u32 %v569_v7, %v565_v32  ;;  %v595_v35 = vshll.u32 %v2122_v31, 16  ;;  %v2125_v7 = vcombine.low %v3236_v44, %v257_v42  ;;  %v259_v44 = vld [vmem:[%s3038_s11 + $0x1c4] sm:$0x1]  ;;  %v261_v31 = vld [vmem:[%s3038_s11 + $0x1cc] sm:$0x1] }
  0x70   : > { %1741 = vmatprep.mubr.bf16.mxu0 %v2140_v39  ;;  %v2197_v39 = vcombine.low %v3408_v12, %v3446_v15  ;;  %v609_v19 = vshll.u32 %v2124_v21, 16  ;;  %v2126_v33 = vcombine.low %v3275_v36, %v259_v44  ;;  %v2127_v47 = vcombine.low %v3286_v51, %v261_v31  ;;  %v263_v42 = vld [vmem:[%s3038_s11 + $0x1d4] sm:$0x1] }
  0x71   : > { %v2200_v22 = vcombine.low %v3446_v15, %v3451_v46  ;;  %v2149_v32 = vcombine.low %v570_v48, %v577_v4  ;;  %v597_v58 = vrot.slane %v595_v35, 1  ;;  %v604_v48 = vrot.slane %v602_v57, 1  ;;  %v265_v57 = vld [vmem:[%s3038_s11 + $0x1dc] sm:$0x1] }
  0x72   : > { %v616_v38 = vshll.u32 %v2125_v7, 16  ;;  %v607_v53 = vshrl.u32 %v2124_v21, 16  ;;  %v614_v35 = vshrl.u32 %v2125_v7, 16  ;;  %v623_v36 = vshll.u32 %v2126_v33, 16 }
  0x73   : > { %1701 = vmatmul.mubr.bf16.gmra.mrb[28].mxu1 %v2200_v22  ;;  %v3771_v22 = vcombine.low %v3056_v40, %v3090_v62  ;;  %v2789_v40 = vld [vmem:[%s3739_s1 + $0x220] sm:$0xff]   ;;  %v2160_v62 = vcombine.low %v3125_v20, %v3169_v50  ;;  %v2793_v20 = vld [vmem:[%s3739_s1 + $0x228] sm:$0xff]   ;;  %v630_v51 = vshll.u32 %v2127_v47, 16  ;;  %v621_v21 = vshrl.u32 %v2126_v33, 16 }
  0x74   : > { %1838 = vmatprep.mubr.bf16.mxu1 %v2142_v14  ;;  %v2158_v14 = vcombine.low %v584_v61, %v591_v9  ;;  %v618_v60 = vrot.slane %v616_v38, 1  ;;  %v202_v50 = vld [vmem:[%s3038_s11 + $0x88] sm:$0xf] }
  0x76   : > { %v619_v9 = vor.u32 %v618_v60, %v614_v35 }
  0x77   : > { %1742 = vmatmul.mubr.bf16.vlgmr.msra.gmra.mrb[32].mxu0 %v2771_v13  ;;  %v600_v13 = vshrl.u32 %v2123_v28, 16  ;;  %v598_v28 = vor.u32 %v597_v58, %v593_v16  ;;  %v625_v16 = vrot.slane %v623_v36, 1  ;;  %v628_v58 = vshrl.u32 %v2127_v47, 16  ;;  %v2791_v47 = vld [vmem:[%s3038_s11 + $0x208] ss:$8 sps:$4 sm:$0xff]  }
  0x78   : > { %2560 = vmatpush3.bf16.msra.mxu0 %v2772_v63  ;;  %1749 = vmatprep.mubr.bf16.mxu0 %v2149_v32  ;;  %v611_v32 = vrot.slane %v609_v19, 1 }
  0x79   : > { %2561 = vmatprep.subr.bf16.mxu0 %v2776_v25  ;;  %v605_v4 = vor.u32 %v604_v48, %v600_v13  ;;  %v3773_v13 = vcombine.low %v3146_v29, %v3192_v2  ;;  %v626_v19 = vor.u32 %v625_v16, %v621_v21  ;;  %v2178_v2 = vcombine.low %v3224_v34, %v3269_v26  ;;  %v3781_v16 = vld [vmem:[#allocation12_spill] sm:$0xff] }
  0x7a   : > { %v612_v61 = vor.u32 %v611_v32, %v607_v53 }
  0x7b   : > { %1839 = vmatmul.mubr.bf16.vlgmr.msra.gmra.mrb[32].mxu1 %v3771_v22  ;;  %v2167_v54 = vcombine.low %v598_v28, %v605_v4  ;;  %v267_v22 = vld [vmem:[%s3038_s11 + $0x1e4] sm:$0x1]  ;;  %v2787_v28 = vld [vmem:[%s3038_s11 + $0x1f8] ss:$8 sps:$4 sm:$0xff]  }
  0x7c   : > { %2562 = vmatpush3.bf16.msra.mxu0 %v2776_v25  ;;  %2599 = vmatpush3.bf16.msra.mxu1 %v2772_v63  ;;  %v2778_v63 = vld [vmem:[%s3038_s11 + $0xf8] ss:$8 sps:$4 sm:$0xff]   ;;  %v2176_v7 = vcombine.low %v612_v61, %v619_v9  ;;  %v2130_v44 = vcombine.low %v3392_v41, %v267_v22  ;;  %v2799_v61 = vld [vmem:[%s3038_s11 + $0x228] ss:$8 sps:$4 sm:$0xff]   ;;  %v3776_v9 = vcombine.low %v3350_v37, %v3413_v17 }
  0x7d   : > { %2563 = vmatprep.subr.bf16.mxu0 %v2780_v55  ;;  %1846 = vmatprep.mubr.bf16.mxu1 %v2151_v23  ;;  %v2129_v23 = vcombine.low %v3339_v0, %v265_v57  ;;  %v3784_v17 = vld [vmem:[#allocation7_spill] sm:$0xff] }
  0x7e   : > { %2592 = vmatprep.subr.bf16.mxu1 %v2776_v25  ;;  %v649_v53 = vshrl.u32 %v2130_v44, 16 }
  0x7f   : > { %1750 = vmatmul.mubr.bf16.gmra.mrb[36].mxu0 %v2774_v43  ;;  %v2782_v43 = vld [vmem:[%s3038_s11 + $0x108] ss:$8 sps:$4 sm:$0xff]   ;;  %v644_v48 = vshll.u32 %v2129_v23, 16 }
  0x80   : > { %1757 = vmatprep.mubr.bf16.mxu0 %v2158_v14  ;;  %2564 = vmatpush3.bf16.msra.mxu0 %v2780_v55  ;;  %v632_v14 = vrot.slane %v630_v51, 1  ;;  %v3775_v51 = vcombine.low %v3295_v8, %v3346_v10  ;;  %v3777_v10 = vld [vmem:[#allocation5_spill] sm:$0xff]  ;;  %v3778_v8 = vld [vmem:[#allocation6_spill] sm:$0xff] }
  0x81   : > { %2565 = vmatprep.subr.bf16.mxu0 %v2785_v56  ;;  %2600 = vmatpush3.bf16.msra.mxu1 %v2776_v25  ;;  %v3772_v25 = vcombine.low %v3096_v1, %v3142_v27  ;;  %v2797_v1 = vld [vmem:[%s3739_s1 + $0x230] sm:$0xff]   ;;  %v2169_v27 = vcombine.low %v3172_v52, %v202_v50  ;;  %v2802_v52 = vld [vmem:[%s3739_s1 + $0x238] sm:$0xff]   ;;  %v646_v33 = vrot.slane %v644_v48, 1 }
  0x82   : > { %2593 = vmatprep.subr.bf16.mxu1 %v2780_v55  ;;  %v633_v38 = vor.u32 %v632_v14, %v628_v58  ;;  %v2795_v50 = vld [vmem:[%s3038_s11 + $0x218] ss:$8 sps:$4 sm:$0xff]  }
  0x83   : > { %1847 = vmatmul.mubr.bf16.gmra.mrb[36].mxu1 %v3772_v25  ;;  %v3774_v25 = vcombine.low %v3244_v49, %v3291_v59  ;;  %v253_v49 = vld [vmem:[%s3038_s11 + $0x1a8] sm:$0xf]  ;;  %v193_v59 = vld [vmem:[%s3038_s11 + $0x44] sm:$0x1]  ;;  %v3785_v14 = vld [vmem:[#allocation8_spill] sm:$0xff] }
  0x84   : > { %2566 = vmatpush3.bf16.msra.mxu0 %v2785_v56  ;;  %1854 = vmatprep.mubr.bf16.mxu1 %v2160_v62  ;;  %v3782_v58 = vld [vmem:[#allocation13_spill] sm:$0xff] }
  0x85   : > { %2567 = vmatprep.subr.bf16.mxu0 %v2789_v40  ;;  %2601 = vmatpush3.bf16.msra.mxu1 %v2780_v55  ;;  %v2128_v55 = vcombine.low %v3327_v18, %v263_v42  ;;  %v192_v18 = vld [vmem:[%s3038_s11 + $0x40] sm:$0xf]  ;;  %v2205_v42 = vcombine.low %v3389_v3, %v253_v49  ;;  %v3783_v37 = vcombine.low %v3781_v16, %v3782_v58 }
  0x86   : > { %2594 = vmatprep.subr.bf16.mxu1 %v2785_v56  ;;  %v2168_v29 = vcombine.low %v3196_v5, %v192_v18  ;;  %v651_v5 = vshll.u32 %v2130_v44, 16  ;;  %v2132_v57 = vcombine.low %v192_v18, %v193_v59  ;;  %v3787_v18 = vld [vmem:[#allocation9_spill] sm:$0xff] }
  0x87   : > { %1758 = vmatmul.mubr.bf16.gmra.mrb[40].mxu0 %v2778_v63  ;;  %v637_v0 = vshll.u32 %v2128_v55, 16  ;;  %v635_v4 = vshrl.u32 %v2128_v55, 16  ;;  %v642_v63 = vshrl.u32 %v2129_v23, 16  ;;  %v3780_v23 = vld [vmem:[#allocation16_spill] sm:$0xff] }
  0x88   : > { %1765 = vmatprep.mubr.bf16.mxu0 %v2167_v54  ;;  %2568 = vmatpush3.bf16.msra.mxu0 %v2789_v40  ;;  %v653_v32 = vrot.slane %v651_v5, 1  ;;  %v673_v21 = vshrl.u32 %v2132_v57, 16 }
  0x89   : > { %2569 = vmatprep.subr.bf16.mxu0 %v2793_v20  ;;  %2602 = vmatpush3.bf16.msra.mxu1 %v2785_v56  ;;  %v269_v56 = vld [vmem:[%s3038_s11 + $0x1ec] sm:$0x1]  ;;  %v639_v62 = vrot.slane %v637_v0, 1  ;;  %v647_v41 = vor.u32 %v646_v33, %v642_v63 }
  0x8a   : > { %2595 = vmatprep.subr.bf16.mxu1 %v2789_v40  ;;  %v2131_v31 = vcombine.low %v3405_v45, %v269_v56  ;;  %v2187_v45 = vcombine.low %v3272_v30, %v3321_v11  ;;  %v2196_v11 = vcombine.low %v3324_v6, %v3378_v24  ;;  %v243_v6 = vld [vmem:[%s3038_s11 + $0x160] sm:$0xf]  ;;  %v244_v24 = vld [vmem:[%s3038_s11 + $0x164] sm:$0x1]  ;;  %v3788_v0 = vld [vmem:[#allocation10_spill] sm:$0xff] }
  0x8b   : > { %1855 = vmatmul.mubr.bf16.gmra.mrb[40].mxu1 %v3773_v13  ;;  %v640_v26 = vor.u32 %v639_v62, %v635_v4  ;;  %v2133_v55 = vcombine.low %v243_v6, %v244_v24  ;;  %v3786_v13 = vcombine.low %v3784_v17, %v3785_v14  ;;  %v3789_v48 = vcombine.low %v3787_v18, %v3788_v0 }
  0x8c   : > { %2570 = vmatpush3.bf16.msra.mxu0 %v2793_v20  ;;  %1862 = vmatprep.mubr.bf16.mxu1 %v2169_v27  ;;  %v658_v34 = vshll.u32 %v2131_v31, 16  ;;  %v656_v35 = vshrl.u32 %v2131_v31, 16  ;;  %v3779_v27 = vcombine.low %v3777_v10, %v3778_v8 }
  0x8d   : > { %2571 = vmatprep.subr.bf16.mxu0 %v2797_v1  ;;  %2603 = vmatpush3.bf16.msra.mxu1 %v2789_v40  ;;  %v2185_v40 = vcombine.low %v626_v19, %v633_v38  ;;  %v2194_v54 = vcombine.low %v640_v26, %v647_v41  ;;  %v680_v22 = vshrl.u32 %v2133_v55, 16  ;;  %v3790_v19 = vld [vmem:[#allocation11_spill] sm:$0xff] }
  0x8e   : > { %2596 = vmatprep.subr.bf16.mxu1 %v2793_v20  ;;  %v660_v60 = vrot.slane %v658_v34, 1  ;;  %v3569_v34 = vld [vmem:[%s3740_s2] ss:$0 sm:$0xff] }
  0x8f   : > { %1766 = vmatmul.mubr.bf16.gmra.mrb[44].mxu0 %v2782_v43  ;;  %v2204_v43 = vcombine.low %v3780_v23, %v243_v6 }
  0x90   : > { %1773 = vmatprep.mubr.bf16.mxu0 %v2176_v7  ;;  %2572 = vmatpush3.bf16.msra.mxu0 %v2797_v1  ;;  %v661_v30 = vor.u32 %v660_v60, %v656_v35  ;;  %v682_v7 = vshll.u32 %v2133_v55, 16 }
  0x91   : > { %2573 = vmatprep.subr.bf16.mxu0 %v2802_v52  ;;  %2604 = vmatpush3.bf16.msra.mxu1 %v2793_v20  ;;  %v654_v20 = vor.u32 %v653_v32, %v649_v53 }
  0x92   : > { %2597 = vmatprep.subr.bf16.mxu1 %v2797_v1  ;;  %v684_v56 = vrot.slane %v682_v7, 1 }
  0x93   : > { %1863 = vmatmul.mubr.bf16.gmra.mrb[44].mxu1 %v2168_v29  ;;  %v2203_v36 = vcombine.low %v654_v20, %v661_v30  ;;  %v3791_v29 = vld [vmem:[#allocation14_spill] sm:$0xff] }
  0x94   : > { %2574 = vmatpush3.bf16.msra.mxu0 %v2802_v52  ;;  %1870 = vmatprep.mubr.bf16.mxu1 %v2178_v2  ;;  %v3792_v2 = vld [vmem:[#allocation15_spill] sm:$0xff]  ;;  %v685_v31 = vor.u32 %v684_v56, %v680_v22 }
  0x95   : > { %2605 = vmatpush3.bf16.msra.mxu1 %v2797_v1  ;;  %v675_v1 = vshll.u32 %v2132_v57, 16  ;;  %v3793_v44 = vcombine.low %v3791_v29, %v3792_v2 }
  0x96   : > { %2598 = vmatprep.subr.bf16.mxu1 %v2802_v52 }
  0x97   : > { %1774 = vmatmul.mubr.bf16.gmra.mrb[48].mxu0 %v2787_v28  ;;  %v677_v3 = vrot.slane %v675_v1, 1  ;;  %v2206_v28 = vcombine.low %v3451_v46, %v685_v31 }
  0x98   : > { %1781 = vmatprep.mubr.bf16.mxu0 %v2185_v40 }
  0x99   : > { %2606 = vmatpush3.bf16.msra.mxu1 %v2802_v52  ;;  %v678_v52 = vor.u32 %v677_v3, %v673_v21 }
  0x9b   : > { %1871 = vmatmul.mubr.bf16.gmra.mrb[48].mxu1 %v3774_v25  ;;  %v2170_v38 = vcombine.low %v3790_v19, %v678_v52 }
  0x9c   : > { %1878 = vmatprep.mubr.bf16.mxu1 %v2187_v45 }
  0x9f   : > { %1782 = vmatmul.mubr.bf16.gmra.mrb[52].mxu0 %v2791_v47 }
  0xa0   : > { %1789 = vmatprep.mubr.bf16.mxu0 %v2194_v54 }
  0xa3   : > { %1879 = vmatmul.mubr.bf16.gmra.mrb[52].mxu1 %v3775_v51 }
  0xa4   : > { %1886 = vmatprep.mubr.bf16.mxu1 %v2196_v11 }
  0xa7   : > { %1790 = vmatmul.mubr.bf16.gmra.mrb[56].mxu0 %v2795_v50 }
  0xa8   : > { %1797 = vmatprep.mubr.bf16.mxu0 %v2203_v36 }
  0xab   : > { %1887 = vmatmul.mubr.bf16.gmra.mrb[56].mxu1 %v3776_v9 }
  0xac   : > { %1894 = vmatprep.mubr.bf16.mxu1 %v2205_v42 }
  0xaf   : > { %1798 = vmatmul.mubr.bf16.gmra.mrb[60].mxu0 %v2799_v61 }
  0xb0   : > { %2575 = vmatprep.mubr.bf16.mxu0 %v3779_v27 }
  0xb3   : > { %1895 = vmatmul.mubr.bf16.gmra.mrb[60].mxu1 %v2204_v43 }
  0xb4   : > { %2583 = vmatprep.mubr.bf16.mxu1 %v3783_v37 }
  0xb7   : > { %2576 = vmatmul.mubr.bf16.vlgmr.msra.gmra.mrb[64].mxu0 %v3786_v13 }
  0xb8   : > { %2579 = vmatprep.mubr.bf16.mxu0 %v3789_v48 }
  0xbb   : > { %2584 = vmatmul.mubr.bf16.vlgmr.msra.gmra.mrb[64].mxu1 %v3793_v44 }
  0xbc   : > { %2587 = vmatprep.mubr.bf16.mxu1 %v2197_v39 }
  0xbf   : > { %2580 = vmatmul.mubr.bf16.gmra.mrb[68].mxu0 %v2170_v38 }
  0xc3   : > { %2588 = vmatmul.mubr.bf16.gmra.mrb[68].mxu1 %v2206_v28 }
 0x10a   : > { %v2303_v4 = vpop.f32.mrb[0].mxu0 }
 0x10b   : > { %v2304_v40 = vpop.f32.mrb[1].mxu0 }
 0x10c   : > { %v2305_v62 = vadd.f32 %v2304_v40, %v2303_v4  ;;  %v2306_v63 = vpop.f32.mrb[2].mxu0  ;;  %v2367_v26 = vpop.f32.mrb[0].mxu1 }
 0x10d   : > { %v2307_v33 = vpop.f32.mrb[3].mxu0  ;;  %v2368_v12 = vpop.f32.mrb[1].mxu1 }
 0x10e   : > { %v2308_v5 = vadd.f32 %v2307_v33, %v2306_v63  ;;  %v1550_v41 = vadd.f32 %v2305_v62, %v3569_v34  ;;  %v2369_v15 = vadd.f32 %v2368_v12, %v2367_v26  ;;  %v2370_v39 = vpop.f32.mrb[2].mxu1 }
 0x10f   : > { %v2371_v47 = vpop.f32.mrb[3].mxu1 }
 0x110   : > { %v1553_v46 = vadd.f32 %v2308_v5, %v3569_v34  ;;  %v3573_v54 = vadd.f32 %v2369_v15, %v1550_v41  ;;  %v2372_v32 = vadd.f32 %v2371_v47, %v2370_v39 }
 0x112   : > { %v2309_v45 = vpop.f32.mrb[4].mxu0  ;;  %v3575_v20 = vadd.f32 %v2372_v32, %v1553_v46 }
 0x113   : > { %v2310_v53 = vpop.f32.mrb[5].mxu0 }
 0x114   : > { %v2311_v35 = vadd.f32 %v2310_v53, %v2309_v45  ;;  %v2312_v60 = vpop.f32.mrb[6].mxu0  ;;  %v2373_v11 = vpop.f32.mrb[4].mxu1 }
 0x115   : > { %v2313_v25 = vpop.f32.mrb[7].mxu0  ;;  %v2374_v36 = vpop.f32.mrb[5].mxu1 }
 0x116   : > { %v2314_v30 = vadd.f32 %v2313_v25, %v2312_v60  ;;  %v1558_v50 = vadd.f32 %v2311_v35, %v3569_v34  ;;  %v2375_v51 = vadd.f32 %v2374_v36, %v2373_v11  ;;  %v2376_v49 = vpop.f32.mrb[6].mxu1 }
 0x117   : > { %v2377_v57 = vpop.f32.mrb[7].mxu1 }
 0x118   : > { %v1561_v59 = vadd.f32 %v2314_v30, %v3569_v34  ;;  %v3579_v9 = vadd.f32 %v2375_v51, %v1558_v50  ;;  %v2378_v6 = vadd.f32 %v2377_v57, %v2376_v49 }
 0x11a   : > { %v2315_v42 = vpop.f32.mrb[8].mxu0  ;;  %v3581_v8 = vadd.f32 %v2378_v6, %v1561_v59 }
 0x11b   : > { %v2316_v61 = vpop.f32.mrb[9].mxu0 }
 0x11c   : > { %v2317_v24 = vadd.f32 %v2316_v61, %v2315_v42  ;;  %v2318_v1 = vpop.f32.mrb[10].mxu0  ;;  %v2379_v55 = vpop.f32.mrb[8].mxu1 }
 0x11d   : > { %v2319_v10 = vpop.f32.mrb[11].mxu0  ;;  %v2380_v43 = vpop.f32.mrb[9].mxu1 }
 0x11e   : > { %v2320_v27 = vadd.f32 %v2319_v10, %v2318_v1  ;;  %v1566_v23 = vadd.f32 %v2317_v24, %v3569_v34  ;;  %v2381_v3 = vadd.f32 %v2380_v43, %v2379_v55  ;;  %v2382_v7 = vpop.f32.mrb[10].mxu1 }
 0x11f   : > { %v2383_v37 = vpop.f32.mrb[11].mxu1 }
 0x120   : > { %v1569_v16 = vadd.f32 %v2320_v27, %v3569_v34  ;;  %v3585_v13 = vadd.f32 %v2381_v3, %v1566_v23  ;;  %v2384_v52 = vadd.f32 %v2383_v37, %v2382_v7 }
 0x122   : > { %v2321_v21 = vpop.f32.mrb[12].mxu0  ;;  %v3587_v48 = vadd.f32 %v2384_v52, %v1569_v16 }
 0x123   : > { %v2322_v58 = vpop.f32.mrb[13].mxu0 }
 0x124   : > { %v2323_v17 = vadd.f32 %v2322_v58, %v2321_v21  ;;  %v2324_v14 = vpop.f32.mrb[14].mxu0  ;;  %v2385_v22 = vpop.f32.mrb[12].mxu1 }
 0x125   : > { %v2325_v18 = vpop.f32.mrb[15].mxu0  ;;  %v2386_v19 = vpop.f32.mrb[13].mxu1 }
 0x126   : > { %v2326_v0 = vadd.f32 %v2325_v18, %v2324_v14  ;;  %v1574_v56 = vadd.f32 %v2323_v17, %v3569_v34  ;;  %v2387_v29 = vadd.f32 %v2386_v19, %v2385_v22  ;;  %v2388_v2 = vpop.f32.mrb[14].mxu1 }
 0x127   : > { %v2389_v28 = vpop.f32.mrb[15].mxu1 }
 0x128   : > { %v1577_v44 = vadd.f32 %v2326_v0, %v3569_v34  ;;  %v3591_v62 = vadd.f32 %v2387_v29, %v1574_v56  ;;  %v2390_v63 = vadd.f32 %v2389_v28, %v2388_v2 }
 0x12a   : > { %v2327_v38 = vpop.f32.mrb[16].mxu0  ;;  %v3593_v26 = vadd.f32 %v2390_v63, %v1577_v44 }
 0x12b   : > { %v2328_v31 = vpop.f32.mrb[17].mxu0 }
 0x12c   : > { %v2329_v4 = vadd.f32 %v2328_v31, %v2327_v38  ;;  %v2330_v40 = vpop.f32.mrb[18].mxu0  ;;  %v2391_v41 = vpop.f32.mrb[16].mxu1 }
 0x12d   : > { %v2331_v33 = vpop.f32.mrb[19].mxu0  ;;  %v2392_v15 = vpop.f32.mrb[17].mxu1 }
 0x12e   : > { %v2332_v5 = vadd.f32 %v2331_v33, %v2330_v40  ;;  %v1582_v12 = vadd.f32 %v2329_v4, %v3569_v34  ;;  %v2393_v46 = vadd.f32 %v2392_v15, %v2391_v41  ;;  %v2394_v45 = vpop.f32.mrb[18].mxu1 }
 0x12f   : > { %v2395_v32 = vpop.f32.mrb[19].mxu1 }
 0x130   : > { %v1585_v47 = vadd.f32 %v2332_v5, %v3569_v34  ;;  %v3597_v25 = vadd.f32 %v2393_v46, %v1582_v12  ;;  %v2396_v30 = vadd.f32 %v2395_v32, %v2394_v45 }
 0x132   : > { %v2333_v39 = vpop.f32.mrb[20].mxu0  ;;  %v3599_v36 = vadd.f32 %v2396_v30, %v1585_v47 }
 0x133   : > { %v2334_v53 = vpop.f32.mrb[21].mxu0 }
 0x134   : > { %v2335_v35 = vadd.f32 %v2334_v53, %v2333_v39  ;;  %v2336_v60 = vpop.f32.mrb[22].mxu0 }
 0x135   : > { %v2337_v11 = vpop.f32.mrb[23].mxu0  ;;  %v2397_v51 = vpop.f32.mrb[20].mxu1 }
 0x136   : > { %v2338_v50 = vadd.f32 %v2337_v11, %v2336_v60  ;;  %v1590_v49 = vadd.f32 %v2335_v35, %v3569_v34  ;;  %v2398_v59 = vpop.f32.mrb[21].mxu1 }
 0x137   : > { %v2399_v57 = vadd.f32 %v2398_v59, %v2397_v51  ;;  %v2400_v61 = vpop.f32.mrb[22].mxu1 }
 0x138   : > { %v1593_v6 = vadd.f32 %v2338_v50, %v3569_v34  ;;  %v2401_v1 = vpop.f32.mrb[23].mxu1 }
 0x139   : > { %v3603_v55 = vadd.f32 %v2399_v57, %v1590_v49  ;;  %v2402_v23 = vadd.f32 %v2401_v1, %v2400_v61 }
 0x13a   : > { %v2339_v42 = vpop.f32.mrb[24].mxu0 }
 0x13b   : > { %v2340_v24 = vpop.f32.mrb[25].mxu0  ;;  %v3605_v3 = vadd.f32 %v2402_v23, %v1593_v6 }
 0x13c   : > { %v2341_v10 = vadd.f32 %v2340_v24, %v2339_v42  ;;  %v2342_v27 = vpop.f32.mrb[26].mxu0 }
 0x13d   : > { %v2343_v43 = vpop.f32.mrb[27].mxu0  ;;  %v2403_v7 = vpop.f32.mrb[24].mxu1 }
 0x13e   : > { %v2344_v21 = vadd.f32 %v2343_v43, %v2342_v27  ;;  %v1598_v16 = vadd.f32 %v2341_v10, %v3569_v34  ;;  %v2404_v58 = vpop.f32.mrb[25].mxu1 }
 0x13f   : > { %v2405_v17 = vadd.f32 %v2404_v58, %v2403_v7  ;;  %v2406_v14 = vpop.f32.mrb[26].mxu1 }
 0x140   : > { %v1601_v52 = vadd.f32 %v2344_v21, %v3569_v34  ;;  %v2407_v0 = vpop.f32.mrb[27].mxu1 }
 0x141   : > { %v3609_v19 = vadd.f32 %v2405_v17, %v1598_v16  ;;  %v2408_v38 = vadd.f32 %v2407_v0, %v2406_v14 }
 0x142   : > { %v2345_v37 = vpop.f32.mrb[28].mxu0 }
 0x143   : > { %v2346_v18 = vpop.f32.mrb[29].mxu0  ;;  %v3611_v44 = vadd.f32 %v2408_v38, %v1601_v52 }
 0x144   : > { %v2347_v22 = vadd.f32 %v2346_v18, %v2345_v37  ;;  %v2348_v56 = vpop.f32.mrb[30].mxu0 }
 0x145   : > { %v2349_v29 = vpop.f32.mrb[31].mxu0 }
 0x146   : > { %v2350_v2 = vadd.f32 %v2349_v29, %v2348_v56  ;;  %v2409_v31 = vpop.f32.mrb[28].mxu1  ;;  %v1606_v28 = vadd.f32 %v2347_v22, %v3569_v34 }
 0x147   : > { %v2410_v4 = vpop.f32.mrb[29].mxu1 }
 0x148   : > { %v2411_v63 = vadd.f32 %v2410_v4, %v2409_v31  ;;  %v2412_v33 = vpop.f32.mrb[30].mxu1  ;;  %v1609_v5 = vadd.f32 %v2350_v2, %v3569_v34 }
 0x149   : > { %v2413_v12 = vpop.f32.mrb[31].mxu1 }
 0x14a   : > { %v2431_v40 = vpop.f32.mrb[32].mxu0  ;;  %v3615_v46 = vadd.f32 %v2411_v63, %v1606_v28  ;;  %v2414_v45 = vadd.f32 %v2413_v12, %v2412_v33 }
 0x14b   : > { %v2432_v41 = vpop.f32.mrb[33].mxu0 }
 0x14c   : > { %v2433_v15 = vadd.f32 %v2432_v41, %v2431_v40  ;;  %v2434_v39 = vpop.f32.mrb[34].mxu0  ;;  %v3618_v35 = vadd.f32 %v2414_v45, %v1609_v5 }
 0x14d   : > { %v2435_v47 = vpop.f32.mrb[35].mxu0 }
 0x14e   : > { %v1744_v53 = vadd.f32 %v2433_v15, %v3573_v54  ;;  %v2436_v32 = vadd.f32 %v2435_v47, %v2434_v39  ;;  %v2495_v30 = vpop.f32.mrb[32].mxu1 }
 0x14f   : > { %v2496_v11 = vpop.f32.mrb[33].mxu1 }
 0x150   : > { %v1747_v60 = vadd.f32 %v2436_v32, %v3575_v20  ;;  %v2497_v50 = vadd.f32 %v2496_v11, %v2495_v30  ;;  %v2498_v51 = vpop.f32.mrb[34].mxu1 }
 0x151   : > { %v2499_v49 = vpop.f32.mrb[35].mxu1 }
 0x152   : > { %v2437_v34 = vpop.f32.mrb[36].mxu0  ;;  %v2500_v42 = vadd.f32 %v2499_v49, %v2498_v51  ;;  %v3621_v6 = vadd.f32 %v2497_v50, %v1744_v53 }
 0x153   : > { %v2438_v59 = vpop.f32.mrb[37].mxu0 }
 0x154   : > { %v2439_v57 = vadd.f32 %v2438_v59, %v2437_v34  ;;  %v2440_v61 = vpop.f32.mrb[38].mxu0  ;;  %v3624_v10 = vadd.f32 %v2500_v42, %v1747_v60 }
 0x155   : > { %v2441_v24 = vpop.f32.mrb[39].mxu0 }
 0x156   : > { %v1752_v54 = vadd.f32 %v2439_v57, %v3579_v9  ;;  %v2442_v1 = vadd.f32 %v2441_v24, %v2440_v61  ;;  %v2501_v27 = vpop.f32.mrb[36].mxu1 }
 0x157   : > { %v2502_v23 = vpop.f32.mrb[37].mxu1 }
 0x158   : > { %v1755_v20 = vadd.f32 %v2442_v1, %v3581_v8  ;;  %v2503_v43 = vadd.f32 %v2502_v23, %v2501_v27  ;;  %v2504_v21 = vpop.f32.mrb[38].mxu1 }
 0x159   : > { %v2505_v16 = vpop.f32.mrb[39].mxu1 }
 0x15a   : > { %v2443_v7 = vpop.f32.mrb[40].mxu0  ;;  %v2506_v37 = vadd.f32 %v2505_v16, %v2504_v21  ;;  %v3627_v52 = vadd.f32 %v2503_v43, %v1752_v54 }
 0x15b   : > { %v2444_v58 = vpop.f32.mrb[41].mxu0 }
 0x15c   : > { %v2445_v17 = vadd.f32 %v2444_v58, %v2443_v7  ;;  %v2446_v14 = vpop.f32.mrb[42].mxu0  ;;  %v3630_v22 = vadd.f32 %v2506_v37, %v1755_v20 }
 0x15d   : > { %v2447_v18 = vpop.f32.mrb[43].mxu0 }
 0x15e   : > { %v1760_v9 = vadd.f32 %v2445_v17, %v3585_v13  ;;  %v2448_v0 = vadd.f32 %v2447_v18, %v2446_v14  ;;  %v2507_v56 = vpop.f32.mrb[40].mxu1 }
 0x15f   : > { %v2508_v38 = vpop.f32.mrb[41].mxu1 }
 0x160   : > { %v1763_v8 = vadd.f32 %v2448_v0, %v3587_v48  ;;  %v2509_v29 = vadd.f32 %v2508_v38, %v2507_v56  ;;  %v2510_v2 = vpop.f32.mrb[42].mxu1 }
 0x161   : > { %v2511_v28 = vpop.f32.mrb[43].mxu1 }
 0x162   : > { %v2449_v31 = vpop.f32.mrb[44].mxu0  ;;  %v2512_v40 = vadd.f32 %v2511_v28, %v2510_v2  ;;  %v3633_v5 = vadd.f32 %v2509_v29, %v1760_v9 }
 0x163   : > { %v2450_v4 = vpop.f32.mrb[45].mxu0 }
 0x164   : > { %v2451_v63 = vadd.f32 %v2450_v4, %v2449_v31  ;;  %v2452_v33 = vpop.f32.mrb[46].mxu0  ;;  %v3636_v15 = vadd.f32 %v2512_v40, %v1763_v8 }
 0x165   : > { %v2453_v41 = vpop.f32.mrb[47].mxu0 }
 0x166   : > { %v1768_v13 = vadd.f32 %v2451_v63, %v3591_v62  ;;  %v2454_v12 = vadd.f32 %v2453_v41, %v2452_v33  ;;  %v2513_v39 = vpop.f32.mrb[44].mxu1 }
 0x167   : > { %v2514_v45 = vpop.f32.mrb[45].mxu1 }
 0x168   : > { %v1771_v48 = vadd.f32 %v2454_v12, %v3593_v26  ;;  %v2515_v47 = vadd.f32 %v2514_v45, %v2513_v39  ;;  %v2516_v53 = vpop.f32.mrb[46].mxu1 }
 0x169   : > { %v2517_v60 = vpop.f32.mrb[47].mxu1 }
 0x16a   : > { %v2455_v32 = vpop.f32.mrb[48].mxu0  ;;  %v2518_v11 = vadd.f32 %v2517_v60, %v2516_v53  ;;  %v3639_v34 = vadd.f32 %v2515_v47, %v1768_v13 }
 0x16b   : > { %v2456_v30 = vpop.f32.mrb[49].mxu0 }
 0x16c   : > { %v2457_v50 = vadd.f32 %v2456_v30, %v2455_v32  ;;  %v2458_v51 = vpop.f32.mrb[50].mxu0  ;;  %v3642_v42 = vadd.f32 %v2518_v11, %v1771_v48 }
 0x16d   : > { %v2459_v49 = vpop.f32.mrb[51].mxu0 }
 0x16e   : > { %v1776_v62 = vadd.f32 %v2457_v50, %v3597_v25  ;;  %v2460_v59 = vadd.f32 %v2459_v49, %v2458_v51  ;;  %v2519_v57 = vpop.f32.mrb[48].mxu1 }
 0x16f   : > { %v2520_v61 = vpop.f32.mrb[49].mxu1 }
 0x170   : > { %v1779_v26 = vadd.f32 %v2460_v59, %v3599_v36  ;;  %v2521_v24 = vadd.f32 %v2520_v61, %v2519_v57  ;;  %v2522_v54 = vpop.f32.mrb[50].mxu1 }
 0x171   : > { %v2523_v27 = vpop.f32.mrb[51].mxu1 }
 0x172   : > { %v2461_v1 = vpop.f32.mrb[52].mxu0  ;;  %v2524_v23 = vadd.f32 %v2523_v27, %v2522_v54  ;;  %v3645_v7 = vadd.f32 %v2521_v24, %v1776_v62 }
 0x173   : > { %v2462_v20 = vpop.f32.mrb[53].mxu0 }
 0x174   : > { %v2463_v43 = vadd.f32 %v2462_v20, %v2461_v1  ;;  %v2464_v21 = vpop.f32.mrb[54].mxu0  ;;  %v3648_v37 = vadd.f32 %v2524_v23, %v1779_v26 }
 0x175   : > { %v2465_v16 = vpop.f32.mrb[55].mxu0 }
 0x176   : > { %v1784_v25 = vadd.f32 %v2463_v43, %v3603_v55  ;;  %v2466_v58 = vadd.f32 %v2465_v16, %v2464_v21  ;;  %v2525_v17 = vpop.f32.mrb[52].mxu1 }
 0x177   : > { %v2526_v14 = vpop.f32.mrb[53].mxu1 }
 0x178   : > { %v1787_v36 = vadd.f32 %v2466_v58, %v3605_v3  ;;  %v2527_v18 = vadd.f32 %v2526_v14, %v2525_v17  ;;  %v2528_v9 = vpop.f32.mrb[54].mxu1 }
 0x179   : > { %v2529_v56 = vpop.f32.mrb[55].mxu1 }
 0x17a   : > { %v2467_v0 = vpop.f32.mrb[56].mxu0  ;;  %v2530_v38 = vadd.f32 %v2529_v56, %v2528_v9  ;;  %v1881_v31 = vadd.f32 %v2527_v18, %v1784_v25 }
 0x17b   : > { %v2468_v8 = vpop.f32.mrb[57].mxu0 }
 0x17c   : > { %v2469_v29 = vadd.f32 %v2468_v8, %v2467_v0  ;;  %v2470_v2 = vpop.f32.mrb[58].mxu0  ;;  %v1884_v40 = vadd.f32 %v2530_v38, %v1787_v36 }
 0x17d   : > { %v2471_v28 = vpop.f32.mrb[59].mxu0 }
 0x17e   : > { %v1792_v55 = vadd.f32 %v2469_v29, %v3609_v19  ;;  %v2472_v4 = vadd.f32 %v2471_v28, %v2470_v2  ;;  %v2531_v63 = vpop.f32.mrb[56].mxu1 }
 0x17f   : > { %v2532_v3 = vpop.f32.mrb[57].mxu1 }
 0x180   : > { %v1795_v33 = vadd.f32 %v2472_v4, %v3611_v44  ;;  %v2533_v41 = vadd.f32 %v2532_v3, %v2531_v63  ;;  %v2534_v13 = vpop.f32.mrb[58].mxu1 }
 0x181   : > { %v2535_v39 = vpop.f32.mrb[59].mxu1 }
 0x182   : > { %v2473_v12 = vpop.f32.mrb[60].mxu0  ;;  %v2536_v45 = vadd.f32 %v2535_v39, %v2534_v13  ;;  %v1889_v32 = vadd.f32 %v2533_v41, %v1792_v55 }
 0x183   : > { %v2474_v48 = vpop.f32.mrb[61].mxu0 }
 0x184   : > { %v2475_v47 = vadd.f32 %v2474_v48, %v2473_v12  ;;  %v2476_v53 = vpop.f32.mrb[62].mxu0  ;;  %v1892_v11 = vadd.f32 %v2536_v45, %v1795_v33 }
 0x185   : > { %v2477_v60 = vpop.f32.mrb[63].mxu0 }
 0x186   : > { %v1800_v19 = vadd.f32 %v2475_v47, %v3615_v46  ;;  %v2478_v30 = vadd.f32 %v2477_v60, %v2476_v53  ;;  %v2537_v44 = vpop.f32.mrb[60].mxu1 }
 0x187   : > { %v2538_v51 = vpop.f32.mrb[61].mxu1 }
 0x188   : > { %v1803_v50 = vadd.f32 %v2478_v30, %v3618_v35  ;;  %v2539_v49 = vadd.f32 %v2538_v51, %v2537_v44  ;;  %v2540_v62 = vpop.f32.mrb[62].mxu1 }
 0x189   : > { %v2541_v57 = vpop.f32.mrb[63].mxu1 }
 0x18a   : > { %v2577_v59 = vpop.f32.mrb[64].mxu0  ;;  %v2542_v24 = vadd.f32 %v2541_v57, %v2540_v62  ;;  %v1897_v46 = vadd.f32 %v2539_v49, %v1800_v19 }
 0x18b   : > { %v1946_v26 = vadd.f32 %v2577_v59, %v3627_v52  ;;  %v1937_v61 = vpop.f32.mrb[65].mxu0 }
 0x18c   : > { %v1938_v54 = vadd.f32 %v1937_v61, %v3621_v6  ;;  %v2578_v1 = vpop.f32.mrb[66].mxu0  ;;  %v1900_v20 = vadd.f32 %v2542_v24, %v1803_v50 }
 0x18d   : > { %2002 = vst [vmem:[%s3660_s19 + $0x10] sm:$0xff] %v1946_v26  ;;  %v1949_v35 = vadd.f32 %v2578_v1, %v3630_v22  ;;  %v1940_v27 = vpop.f32.mrb[67].mxu0 }
 0x18e   : > { %2000 = vst [vmem:[%s3660_s19] sm:$0xff] %v1938_v54  ;;  %v1941_v52 = vadd.f32 %v1940_v27, %v3624_v10  ;;  %v2585_v6 = vpop.f32.mrb[64].mxu1 }
 0x18f   : > { %2003 = vst [vmem:[%s3660_s19 + $0x18] sm:$0xff] %v1949_v35  ;;  %v1978_v23 = vadd.f32 %v2585_v6, %v1881_v31  ;;  %v1969_v43 = vpop.f32.mrb[65].mxu1 }
 0x190   : > { %2001 = vst [vmem:[%s3660_s19 + $0x8] sm:$0xff] %v1941_v52  ;;  %v1970_v21 = vadd.f32 %v1969_v43, %v3645_v7  ;;  %v2586_v16 = vpop.f32.mrb[66].mxu1 }
 0x191   : > { %2010 = vst [vmem:[%s3660_s19 + $0x50] sm:$0xff] %v1978_v23  ;;  %v1981_v22 = vadd.f32 %v2586_v16, %v1884_v40  ;;  %v1972_v58 = vpop.f32.mrb[67].mxu1 }
 0x192   : > { %v2581_v25 = vpop.f32.mrb[68].mxu0  ;;  %2008 = vst [vmem:[%s3660_s19 + $0x40] sm:$0xff] %v1970_v21  ;;  %v1973_v36 = vadd.f32 %v1972_v58, %v3648_v37 }
 0x193   : > { %v1962_v10 = vadd.f32 %v2581_v25, %v3639_v34  ;;  %v1953_v17 = vpop.f32.mrb[69].mxu0  ;;  %2011 = vst [vmem:[%s3660_s19 + $0x58] sm:$0xff] %v1981_v22 }
 0x194   : > { %v1954_v14 = vadd.f32 %v1953_v17, %v3633_v5  ;;  %v2582_v7 = vpop.f32.mrb[70].mxu0  ;;  %2009 = vst [vmem:[%s3660_s19 + $0x48] sm:$0xff] %v1973_v36 }
 0x195   : > { %2006 = vst [vmem:[%s3660_s19 + $0x30] sm:$0xff] %v1962_v10  ;;  %v1965_v18 = vadd.f32 %v2582_v7, %v3642_v42  ;;  %v1956_v9 = vpop.f32.mrb[71].mxu0 }
 0x196   : > { %2004 = vst [vmem:[%s3660_s19 + $0x20] sm:$0xff] %v1954_v14  ;;  %v1957_v34 = vadd.f32 %v1956_v9, %v3636_v15  ;;  %v2589_v0 = vpop.f32.mrb[68].mxu1 }
 0x197   : > { %2007 = vst [vmem:[%s3660_s19 + $0x38] sm:$0xff] %v1965_v18  ;;  %v1994_v5 = vadd.f32 %v2589_v0, %v1897_v46  ;;  %v1985_v37 = vpop.f32.mrb[69].mxu1 }
 0x198   : > { %2005 = vst [vmem:[%s3660_s19 + $0x28] sm:$0xff] %v1957_v34  ;;  %v1986_v56 = vadd.f32 %v1985_v37, %v1889_v32  ;;  %v2590_v8 = vpop.f32.mrb[70].mxu1 }
 0x199   : > { %2014 = vst [vmem:[%s3660_s19 + $0x70] sm:$0xff] %v1994_v5  ;;  %v1997_v42 = vadd.f32 %v2590_v8, %v1900_v20  ;;  %v1988_v38 = vpop.f32.mrb[71].mxu1 }
 0x19a   : > { %2012 = vst [vmem:[%s3660_s19 + $0x60] sm:$0xff] %v1986_v56  ;;  %v1989_v15 = vadd.f32 %v1988_v38, %v1892_v11 }
 0x19b   : > { %2015 = vst [vmem:[%s3660_s19 + $0x78] sm:$0xff] %v1997_v42 }
 0x19c   : > { %2013 = vst [vmem:[%s3660_s19 + $0x68] sm:$0xff] %v1989_v15 }
 0x19d   : > { %2816 = shalt.err (!%p2813_p3)
}
 0x19e   : > { %s2817_s30 = scalar_lea.hbm %s3688_s25, 2048  ;;  %s2821_s6 = scalar_lea.hbm %s3741_s3, 4096 }
 0x19f   : > { %p2818_p4 = scmp.ne.s32.totalorder %s3688_s25, %s2817_s30  ;;  %p2822_p9 = scmp.lt.u32.totalorder %s3688_s25, %s3741_s3 }
 0x1a0   : > { %p2823_p10 = scmp.lt.u32.totalorder %s2821_s6, %s2817_s30  ;;  %p2825_p12 = scmp.lt.u32.totalorder %s2817_s30, %s3688_s25 }
 0x1a1   : > { %p2819_p7 = pnand %p2818_p4, %p2928_p5 }
 0x1a2   : > { %p2824_p11 = por %p2823_p10, %p2822_p9 }
 0x1a3   : > { %p2820_p8 = pneg %p2819_p7 }
 0x1a4   : > { %p2826_p13 = por %p2825_p12, %p2824_p11 }
 0x1a6   : > { %p2827_p0 = pnand %p2826_p13, %p2820_p8 }
 0x1a8   : > { %2830 = shalt.err (!%p2827_p0)
}
 0x1a9   : > { %s2868_s8 = smov 128   ;;  %s2869_s9 = smov 8  }
 0x1aa   : > { %2608 = dma.vmem_to_hbm [thread:$0]  (%p2928_p5), %s3690_s17, 2048, %s3688_s25, %s3697_s16, %s2868_s8, %s2868_s8, %s2869_s9  }
 0x1ab PF: > { %p2614_p1 = scmp.ge.s32.totalorder %s2865_s15, 2  ;;  %s2046_s19 = sand.u32 1, %s2853_s12  }
 0x1ac   : > { %s2047_s10 = scalar_lea.sflag [#allocation3], %s2046_s19 }
 0x1ad   : > { %p2611_p2 = pnand %p2614_p1, %p2932_p6 }
 0x1af   : > { %2848 = dma.done.wait (!%p2611_p2), %s2047_s10, 2048  }
 0x1b0   : > { %2850 = vsyncadd (!%p2611_p2), %s2047_s10, 4294965248  ;;  %p13_p3 = scmp.ge.s32.totalorder %s2915_s18, 4   ;;  %s3794_s12 = smov %s2857_s13 }
 0x1b1   : > { %s3795_s13 = smov %s2861_s14  ;;  %s3796_s14 = smov %s2926_s21 }
 0x1b2   : > { %s3797_s15 = smov %s2915_s18  ;;  %15 = sbr.rel (!%p13_p3) target bundleno = 3 (0x3), region = 67 }
 0x1b9   :  { %2052 = vsyncpa [#allocation3], 1 }
 0x1ba   :  { %2054 = vsyncpa [#allocation3 + $0x1], 1 }

</bundles_post_ra>
